<compile_context>
chip_gen: v5e
topology: v5e:2x2
jax: 0.10.0
libtpu: 0.0.40
codegen_flags: <defaults>
</compile_context>

<pallas_src>
import jax
import jax.numpy as jnp
from jax.experimental import pallas as pl
from jax.experimental.pallas import tpu as pltpu


# ----------------------------- Pallas kernel ------------------------------ #
def outputmodule_kernel(x_ref, w1_ref, b1_ref, w2_ref, b2_ref, o_ref):
    # Hidden layer: Linear + ReLU  (MXU matmul, VPU elementwise)
    x = x_ref[...]
    h = jnp.dot(x, w1_ref[...], preferred_element_type=jnp.float32) + b1_ref[...]
    h = jnp.maximum(h, 0.0)

    # Output layer: Linear (true 64-lane output, no padding)
    y = jnp.dot(h, w2_ref[...], preferred_element_type=jnp.float32) + b2_ref[...]

    # NB_Layer.forward == softmax over last dim (numerically stable).
    y = y - jnp.max(y, axis=-1, keepdims=True)
    e = jnp.exp(y)
    l = jnp.sum(e, axis=-1, keepdims=True)
    # EUP approximate reciprocal + one Newton step -> ~f32-accurate, VALU-light.
    r0 = pl.reciprocal(l, approx=True)
    inv = r0 * (2.0 - l * r0)
    o_ref[...] = (e * inv).astype(o_ref.dtype)


# ----------------------------- wrapper ------------------------------------ #
@jax.jit
def output_module_forward(x, w1, b1, w2, b2):
    B, d_in = x.shape
    d_in_w, d_h = w1.shape
    d_h_w, d_out = w2.shape
    assert d_in == d_in_w and d_h == d_h_w

    # Grid of at most 2 steps:
    #   - 2 "parallel" steps (one per v7x TensorCore) for large even batches,
    #   - 1 full-batch step otherwise (best on single-TC v5e / v6e; also
    #     satisfies the (8,128) block-shape rule for arbitrary small B).
    if B >= 512 and B % 2 == 0 and (B // 2) % 8 == 0:
        n_steps = 2
    else:
        n_steps = 1
    batch_tile = B // n_steps

    return pl.pallas_call(
        outputmodule_kernel,
        out_shape=jax.ShapeDtypeStruct((B, d_out), jnp.float32),
        grid_spec=pltpu.PrefetchScalarGridSpec(
            num_scalar_prefetch=0,
            grid=(n_steps,),
            in_specs=[
                pl.BlockSpec((batch_tile, d_in), lambda i: (i, 0)),  # x tile (pipelined)
                pl.BlockSpec((d_in, d_h), lambda i: (0, 0)),         # W1 (resident)
                pl.BlockSpec((1, d_h), lambda i: (0, 0)),            # b1 (resident)
                pl.BlockSpec((d_h, d_out), lambda i: (0, 0)),        # W2 (resident)
                pl.BlockSpec((1, d_out), lambda i: (0, 0)),          # b2 (resident)
            ],
            out_specs=pl.BlockSpec((batch_tile, d_out), lambda i: (i, 0)),
        ),
        compiler_params=pltpu.CompilerParams(
            dimension_semantics=("parallel",)
        ),
    )(x, w1, b1, w2, b2)


# ----------------------------- reference (pure JAX) ------------------------ #
def reference_forward(x, w1, b1, w2, b2):
    h = jnp.maximum(x @ w1 + b1, 0.0)
    y = h @ w2 + b2
    return jax.nn.softmax(y, axis=-1)


# --------------------------------- main ------------------------------------ #
if __name__ == "__main__":
    # Module hyperparameters (derived from OutputModule.__init__, see header)
    in_features = 32
    out_features = 64
    hidden = 32          # layer_width * max(hidden_features, round(sqrt(out_features))) = 2*16
    batch = 1024         # -> 2 "parallel" grid steps of 512 rows (both v7x TCs)

    key = jax.random.PRNGKey(0)
    kx, k1, k2, k3, k4 = jax.random.split(key, 5)

    # Deterministic parameter init (uniform like torch.nn.Linear default)
    bound1 = 1.0 / jnp.sqrt(in_features)
    bound2 = 1.0 / jnp.sqrt(hidden)
    w1 = jax.random.uniform(k1, (in_features, hidden), jnp.float32, -bound1, bound1)
    b1 = jax.random.uniform(k2, (1, hidden), jnp.float32, -bound1, bound1)
    w2 = jax.random.uniform(k3, (hidden, out_features), jnp.float32, -bound2, bound2)
    b2 = jax.random.uniform(k4, (1, out_features), jnp.float32, -bound2, bound2)

    x = jax.random.normal(kx, (batch, in_features), jnp.float32)

    out = output_module_forward(x, w1, b1, w2, b2)
    out = jax.block_until_ready(out)

    ref = reference_forward(x, w1, b1, w2, b2)
    assert out.shape == (batch, out_features)
    assert jnp.allclose(out, ref, atol=2e-5, rtol=2e-5)
    # rows of a softmax sum to 1
    assert jnp.allclose(jnp.sum(out, axis=-1), jnp.ones((batch,)), atol=1e-4)

    # TODO(synk): NB_Layer.log_prob / loss / rescale / dispersion are not part of
    # forward(); only the forward pass (MLP + softmax) is kernelized here.
    print("KERNEL_OK")
</pallas_src>

<mosaic_0001>
module attributes {stable_mosaic.version = 11 : i64} {
  func.func @outputmodule_kernel(%arg0: i32, %arg1: memref<512x32xf32, #tpu.memory_space<vmem>>, %arg2: memref<32x32xf32, #tpu.memory_space<vmem>>, %arg3: memref<1x32xf32, #tpu.memory_space<vmem>>, %arg4: memref<32x64xf32, #tpu.memory_space<vmem>>, %arg5: memref<1x64xf32, #tpu.memory_space<vmem>>, %arg6: memref<512x64xf32, #tpu.memory_space<vmem>>) attributes {dimension_semantics = [#tpu.dimension_semantics<parallel>], iteration_bounds = array<i64: 2>, scalar_prefetch = 0 : i64, scratch_operands = 0 : i64, tpu.core_type = #tpu.core_type<tc>, window_params = [{transform_indices = @transform_0, window_bounds = array<i64: 512, 32>}, {pipeline_mode = #tpu.pipeline_mode<synchronous>, transform_indices = @transform_1, window_bounds = array<i64: 32, 32>}, {pipeline_mode = #tpu.pipeline_mode<synchronous>, transform_indices = @transform_2, window_bounds = array<i64: 1, 32>}, {pipeline_mode = #tpu.pipeline_mode<synchronous>, transform_indices = @transform_3, window_bounds = array<i64: 32, 64>}, {pipeline_mode = #tpu.pipeline_mode<synchronous>, transform_indices = @transform_4, window_bounds = array<i64: 1, 64>}, {transform_indices = @transform_5, window_bounds = array<i64: 512, 64>}]} {
    %c0 = arith.constant 0 : index
    %c0_0 = arith.constant 0 : index
    %0 = vector.load %arg1[%c0, %c0_0] : memref<512x32xf32, #tpu.memory_space<vmem>>, vector<512x32xf32>
    %c0_1 = arith.constant 0 : index
    %c0_2 = arith.constant 0 : index
    %1 = vector.load %arg2[%c0_1, %c0_2] : memref<32x32xf32, #tpu.memory_space<vmem>>, vector<32x32xf32>
    %cst = arith.constant dense<0.000000e+00> : vector<512x32xf32>
    %2 = tpu.matmul %0, %1, %cst {dimension_numbers = #tpu.dot_dimension_numbers<[1], [0], [0], [1], [0, 0, 1, 1], [], []>} : vector<512x32xf32>, vector<32x32xf32>, vector<512x32xf32> -> vector<512x32xf32>
    %c0_3 = arith.constant 0 : index
    %c0_4 = arith.constant 0 : index
    %3 = vector.load %arg3[%c0_3, %c0_4] : memref<1x32xf32, #tpu.memory_space<vmem>>, vector<1x32xf32>
    %4 = vector.broadcast %3 : vector<1x32xf32> to vector<512x32xf32>
    %5 = arith.addf %2, %4 : vector<512x32xf32>
    %cst_5 = arith.constant 0.000000e+00 : f32
    %6 = vector.broadcast %cst_5 : f32 to vector<512x32xf32>
    %7 = arith.maximumf %5, %6 : vector<512x32xf32>
    %c0_6 = arith.constant 0 : index
    %c0_7 = arith.constant 0 : index
    %8 = vector.load %arg4[%c0_6, %c0_7] : memref<32x64xf32, #tpu.memory_space<vmem>>, vector<32x64xf32>
    %cst_8 = arith.constant dense<0.000000e+00> : vector<512x64xf32>
    %9 = tpu.matmul %7, %8, %cst_8 {dimension_numbers = #tpu.dot_dimension_numbers<[1], [0], [0], [1], [0, 0, 1, 1], [], []>} : vector<512x32xf32>, vector<32x64xf32>, vector<512x64xf32> -> vector<512x64xf32>
    %c0_9 = arith.constant 0 : index
    %c0_10 = arith.constant 0 : index
    %10 = vector.load %arg5[%c0_9, %c0_10] : memref<1x64xf32, #tpu.memory_space<vmem>>, vector<1x64xf32>
    %11 = vector.broadcast %10 : vector<1x64xf32> to vector<512x64xf32>
    %12 = arith.addf %9, %11 : vector<512x64xf32>
    %cst_11 = arith.constant dense<0xFF800000> : vector<512xf32>
    %13 = vector.multi_reduction <maximumf>, %12, %cst_11 [1] : vector<512x64xf32> to vector<512xf32>
    %14 = vector.shape_cast %13 : vector<512xf32> to vector<512x1xf32>
    %15 = vector.broadcast %14 : vector<512x1xf32> to vector<512x64xf32>
    %16 = arith.subf %12, %15 : vector<512x64xf32>
    %17 = math.exp %16 : vector<512x64xf32>
    %cst_12 = arith.constant dense<0.000000e+00> : vector<512xf32>
    %18 = vector.multi_reduction <add>, %17, %cst_12 [1] : vector<512x64xf32> to vector<512xf32>
    %19 = vector.shape_cast %18 : vector<512xf32> to vector<512x1xf32>
    %20 = tpu.reciprocal %19 {approx = true} : vector<512x1xf32> -> vector<512x1xf32>
    %21 = arith.mulf %19, %20 : vector<512x1xf32>
    %cst_13 = arith.constant 2.000000e+00 : f32
    %22 = vector.broadcast %cst_13 : f32 to vector<512x1xf32>
    %23 = arith.subf %22, %21 : vector<512x1xf32>
    %24 = arith.mulf %20, %23 : vector<512x1xf32>
    %25 = vector.broadcast %24 : vector<512x1xf32> to vector<512x64xf32>
    %26 = arith.mulf %17, %25 : vector<512x64xf32>
    %c0_14 = arith.constant 0 : index
    %c0_15 = arith.constant 0 : index
    %27 = vector.load %arg6[%c0_14, %c0_15] : memref<512x64xf32, #tpu.memory_space<vmem>>, vector<512x64xf32>
    tpu.vector_store %arg6[%c0_14, %c0_15], %26 {strides = array<i32>} : memref<512x64xf32, #tpu.memory_space<vmem>>, vector<512x64xf32>,
    return
  }
  func.func @transform_0(%arg0: i32) -> (i32, i32) {
    %c0_i32 = arith.constant 0 : i32
    %c0_i32_0 = arith.constant 0 : i32
    return %arg0, %c0_i32 : i32, i32
  }
  func.func @transform_1(%arg0: i32) -> (i32, i32) {
    %c0_i32 = arith.constant 0 : i32
    %c0_i32_0 = arith.constant 0 : i32
    %c0_i32_1 = arith.constant 0 : i32
    return %c0_i32, %c0_i32_0 : i32, i32
  }
  func.func @transform_2(%arg0: i32) -> (i32, i32) {
    %c0_i32 = arith.constant 0 : i32
    %c0_i32_0 = arith.constant 0 : i32
    %c0_i32_1 = arith.constant 0 : i32
    return %c0_i32, %c0_i32_0 : i32, i32
  }
  func.func @transform_3(%arg0: i32) -> (i32, i32) {
    %c0_i32 = arith.constant 0 : i32
    %c0_i32_0 = arith.constant 0 : i32
    %c0_i32_1 = arith.constant 0 : i32
    return %c0_i32, %c0_i32_0 : i32, i32
  }
  func.func @transform_4(%arg0: i32) -> (i32, i32) {
    %c0_i32 = arith.constant 0 : i32
    %c0_i32_0 = arith.constant 0 : i32
    %c0_i32_1 = arith.constant 0 : i32
    return %c0_i32, %c0_i32_0 : i32, i32
  }
  func.func @transform_5(%arg0: i32) -> (i32, i32) {
    %c0_i32 = arith.constant 0 : i32
    %c0_i32_0 = arith.constant 0 : i32
    return %arg0, %c0_i32 : i32, i32
  }
}

</mosaic_0001>

<bundles_post_ra>
// kernel: output_module_forward.1
= control target key start
LH: loop header
LB: loop body
LE: loop exit
PB: predicated region body
PF: predicated region fallthrough
CT: control target
= control target key end

     0   :  { %s2644_s18 = smov 0   ;;  %s3850_s0 = inlined_call_operand.vmem [shape: f32[1024,32], index: 0, kind: input, shape index: {}]   ;;  %s3851_s1 = inlined_call_operand.vmem [shape: f32[32,32], index: 1, kind: input, shape index: {}]   ;;  %s3852_s2 = inlined_call_operand.vmem [shape: f32[1,32], index: 2, kind: input, shape index: {}]   ;;  %s3853_s3 = inlined_call_operand.vmem [shape: f32[32,64], index: 3, kind: input, shape index: {}]   ;;  %s3854_s4 = inlined_call_operand.vmem [shape: f32[1,64], index: 4, kind: input, shape index: {}]   ;;  %s3855_s5 = inlined_call_operand.vmem [shape: f32[1024,64], index: 5, kind: output, shape index: {}]  }
   0x1 LB: > { %s2192_s19 = sadd.s32 4294967295, %s2612_s18   ;;  %p2196_p0 = scmp.ge.s32.totalorder %s2612_s18, 1  ;;  %s2612_s18 = sphi %s2644_s18, %s15_s18  }
   0x2   : > { %p188_p1 = scmp.lt.s32.totalorder %s2612_s18, 3 }
   0x4   : > { %p189_p2 = pnand %p2196_p0, %p188_p1 }
   0x6   : > { %192 = sbr.rel (%p189_p2) target bundleno = 840 (0x348), region = 40 }
   0xb   : > { %v295_v0 = vld [vmem:[%s3851_s1 + $0x18] sm:$0xff]  ;;  %v294_v1 = vld [vmem:[%s3851_s1 + $0x10] sm:$0xff]  ;;  %s2197_s24 = sshll.u32 %s2192_s19, 6  ;;  %v293_v2 = vld [vmem:[%s3851_s1 + $0x8] sm:$0xff]  ;;  %vm300_vm0 = vcmask 261120   ;;  %vm1175_vm1 = vcmask 523264  }
   0xc   : > { %505 = vmatpush.msra.mxu0 %v295_v0  ;;  %2331 = vmatpush.msra.mxu2 %v295_v0  ;;  %p217_p3 = scmp.lt.s32.totalorder %s2197_s24, 127  ;;  %v292_v3 = vld [vmem:[%s3851_s1] sm:$0xff]  ;;  %v769_v28 = vld [vmem:[%s3853_s3 + $0x18] sm:$0xff]  ;;  %v768_v29 = vld [vmem:[%s3853_s3 + $0x10] sm:$0xff] }
   0xd   : > { %978 = vmatpush.msra.mxu1 %v769_v28  ;;  %2335 = vmatpush.msra.mxu3 %v769_v28  ;;  %v767_v32 = vld [vmem:[%s3853_s3 + $0x8] sm:$0xff]  ;;  %v766_v33 = vld [vmem:[%s3853_s3] sm:$0xff] }
   0xe   : > { %506 = vmatpush.msra.mxu0 %v294_v1  ;;  %2332 = vmatpush.msra.mxu2 %v294_v1  ;;  %s3917_s24 = smov (!%p217_p3, %s2197_s24), 127  ;;  %v2753_v40 = vld [vmem:[%s3852_s2] ss:$0 sm:$0xff] }
   0xf   : > { %s2198_s29 = sshll.u32 %s3917_s24, 3  ;;  %979 = vmatpush.msra.mxu1 %v768_v29  ;;  %2336 = vmatpush.msra.mxu3 %v768_v29 }
  0x10   : > { %507 = vmatpush.msra.mxu0 %v293_v2  ;;  %2333 = vmatpush.msra.mxu2 %v293_v2  ;;  %s2672_s7 = scalar_lea.vmem %s3850_s0, %s2198_s29  ;;  %s3412_s26 = scalar_lea.vmem %s3855_s5, %s2198_s29 }
  0x11   : > { %v228_v4 = vld [vmem:[%s2672_s7] sm:$0xff]  ;;  %v229_v6 = vld [vmem:[%s2672_s7 + $0x8] sm:$0xff]  ;;  %v230_v8 = vld [vmem:[%s2672_s7 + $0x10] sm:$0xff]  ;;  %980 = vmatpush.msra.mxu1 %v767_v32  ;;  %2337 = vmatpush.msra.mxu3 %v767_v32 }
  0x12   : > { %508 = vmatpush.msra.mxu0 %v292_v3  ;;  %2334 = vmatpush.msra.mxu2 %v292_v3  ;;  %v260_v5 = vld [vmem:[%s2672_s7 + $0x100] sm:$0xff]  ;;  %v261_v7 = vld [vmem:[%s2672_s7 + $0x108] sm:$0xff]  ;;  %v262_v9 = vld [vmem:[%s2672_s7 + $0x110] sm:$0xff] }
  0x13   : > { %2201 = vmatmul.msk.f32.vlgmr.msra.gmra.mxu0 %vm300_vm0, %v228_v4  ;;  %2233 = vmatmul.msk.f32.vlgmr.msra.gmra.mxu2 %vm300_vm0, %v260_v5  ;;  %v231_v10 = vld [vmem:[%s2672_s7 + $0x18] sm:$0xff]  ;;  %v232_v12 = vld [vmem:[%s2672_s7 + $0x20] sm:$0xff]  ;;  %v265_v14 = vld [vmem:[%s2672_s7 + $0x128] sm:$0xff] }
  0x14   : > { %v263_v11 = vld [vmem:[%s2672_s7 + $0x118] sm:$0xff]  ;;  %v264_v13 = vld [vmem:[%s2672_s7 + $0x120] sm:$0xff]  ;;  %v233_v15 = vld [vmem:[%s2672_s7 + $0x28] sm:$0xff]  ;;  %981 = vmatpush.msra.mxu1 %v766_v33  ;;  %2338 = vmatpush.msra.mxu3 %v766_v33 }
  0x15   : > { %v266_v16 = vld [vmem:[%s2672_s7 + $0x130] sm:$0xff]  ;;  %v267_v18 = vld [vmem:[%s2672_s7 + $0x138] sm:$0xff]  ;;  %v268_v20 = vld [vmem:[%s2672_s7 + $0x140] sm:$0xff] }
  0x16   : > { %v234_v17 = vld [vmem:[%s2672_s7 + $0x30] sm:$0xff]  ;;  %v235_v19 = vld [vmem:[%s2672_s7 + $0x38] sm:$0xff]  ;;  %v236_v21 = vld [vmem:[%s2672_s7 + $0x40] sm:$0xff] }
  0x17   : > { %v269_v22 = vld [vmem:[%s2672_s7 + $0x148] sm:$0xff]  ;;  %v270_v24 = vld [vmem:[%s2672_s7 + $0x150] sm:$0xff]  ;;  %v271_v26 = vld [vmem:[%s2672_s7 + $0x158] sm:$0xff] }
  0x18   : > { %v237_v23 = vld [vmem:[%s2672_s7 + $0x48] sm:$0xff]  ;;  %v238_v25 = vld [vmem:[%s2672_s7 + $0x50] sm:$0xff]  ;;  %v239_v27 = vld [vmem:[%s2672_s7 + $0x58] sm:$0xff] }
  0x19   : > { %v272_v30 = vld [vmem:[%s2672_s7 + $0x160] sm:$0xff]  ;;  %v273_v34 = vld [vmem:[%s2672_s7 + $0x168] sm:$0xff]  ;;  %v274_v36 = vld [vmem:[%s2672_s7 + $0x170] sm:$0xff] }
  0x1a   : > { %v240_v31 = vld [vmem:[%s2672_s7 + $0x60] sm:$0xff]  ;;  %v241_v35 = vld [vmem:[%s2672_s7 + $0x68] sm:$0xff]  ;;  %v242_v37 = vld [vmem:[%s2672_s7 + $0x70] sm:$0xff] }
  0x1b   : > { %2202 = vmatmul.msk.f32.gmra.mxu0 %vm300_vm0, %v229_v6  ;;  %2234 = vmatmul.msk.f32.gmra.mxu2 %vm300_vm0, %v261_v7  ;;  %v275_v38 = vld [vmem:[%s2672_s7 + $0x178] sm:$0xff]  ;;  %v276_v42 = vld [vmem:[%s2672_s7 + $0x180] sm:$0xff]  ;;  %v277_v49 = vld [vmem:[%s2672_s7 + $0x188] sm:$0xff] }
  0x1c   : > { %v243_v39 = vld [vmem:[%s2672_s7 + $0x78] sm:$0xff]  ;;  %v244_v43 = vld [vmem:[%s2672_s7 + $0x80] sm:$0xff]  ;;  %v245_v52 = vld [vmem:[%s2672_s7 + $0x88] sm:$0xff] }
  0x1d   : > { %v278_v57 = vld [vmem:[%s2672_s7 + $0x190] sm:$0xff]  ;;  %v279_v1 = vld [vmem:[%s2672_s7 + $0x198] sm:$0xff] }
  0x1e   : > { %v246_v60 = vld [vmem:[%s2672_s7 + $0x90] sm:$0xff]  ;;  %v247_v4 = vld [vmem:[%s2672_s7 + $0x98] sm:$0xff] }
  0x1f   : > { %v250_v28 = vld [vmem:[%s2672_s7 + $0xb0] sm:$0xff]  ;;  %v283_v33 = vld [vmem:[%s2672_s7 + $0x1b8] sm:$0xff] }
  0x23   : > { %2203 = vmatmul.msk.f32.gmra.mxu0 %vm300_vm0, %v230_v8  ;;  %2235 = vmatmul.msk.f32.gmra.mxu2 %vm300_vm0, %v262_v9  ;;  %v280_v9 = vld [vmem:[%s2672_s7 + $0x1a0] sm:$0xff] }
  0x2b   : > { %2204 = vmatmul.msk.f32.gmra.mxu0 %vm300_vm0, %v231_v10  ;;  %2236 = vmatmul.msk.f32.gmra.mxu2 %vm300_vm0, %v263_v11 }
  0x33   : > { %2205 = vmatmul.msk.f32.gmra.mxu0 %vm300_vm0, %v232_v12  ;;  %2237 = vmatmul.msk.f32.gmra.mxu2 %vm300_vm0, %v264_v13  ;;  %v248_v12 = vld [vmem:[%s2672_s7 + $0xa0] sm:$0xff] }
  0x3b   : > { %2238 = vmatmul.msk.f32.gmra.mxu2 %vm300_vm0, %v265_v14  ;;  %2206 = vmatmul.msk.f32.gmra.mxu0 %vm300_vm0, %v233_v15 }
  0x43   : > { %2239 = vmatmul.msk.f32.gmra.mxu2 %vm300_vm0, %v266_v16  ;;  %2207 = vmatmul.msk.f32.gmra.mxu0 %vm300_vm0, %v234_v17  ;;  %v281_v17 = vld [vmem:[%s2672_s7 + $0x1a8] sm:$0xff] }
  0x4b   : > { %2240 = vmatmul.msk.f32.gmra.mxu2 %vm300_vm0, %v267_v18  ;;  %2208 = vmatmul.msk.f32.gmra.mxu0 %vm300_vm0, %v235_v19 }
  0x53   : > { %2241 = vmatmul.msk.f32.gmra.mxu2 %vm300_vm0, %v268_v20  ;;  %2209 = vmatmul.msk.f32.gmra.mxu0 %vm300_vm0, %v236_v21  ;;  %v249_v20 = vld [vmem:[%s2672_s7 + $0xa8] sm:$0xff] }
  0x5b   : > { %2242 = vmatmul.msk.f32.gmra.mxu2 %vm300_vm0, %v269_v22  ;;  %2210 = vmatmul.msk.f32.gmra.mxu0 %vm300_vm0, %v237_v23 }
  0x63   : > { %2243 = vmatmul.msk.f32.gmra.mxu2 %vm300_vm0, %v270_v24  ;;  %2211 = vmatmul.msk.f32.gmra.mxu0 %vm300_vm0, %v238_v25  ;;  %v282_v25 = vld [vmem:[%s2672_s7 + $0x1b0] sm:$0xff] }
  0x6b   : > { %2244 = vmatmul.msk.f32.gmra.mxu2 %vm300_vm0, %v271_v26  ;;  %2212 = vmatmul.msk.f32.gmra.mxu0 %vm300_vm0, %v239_v27 }
  0x73   : > { %2245 = vmatmul.msk.f32.gmra.mxu2 %vm300_vm0, %v272_v30  ;;  %2213 = vmatmul.msk.f32.gmra.mxu0 %vm300_vm0, %v240_v31 }
  0x7b   : > { %2246 = vmatmul.msk.f32.gmra.mxu2 %vm300_vm0, %v273_v34  ;;  %2214 = vmatmul.msk.f32.gmra.mxu0 %vm300_vm0, %v241_v35 }
  0x83   : > { %2247 = vmatmul.msk.f32.gmra.mxu2 %vm300_vm0, %v274_v36  ;;  %2215 = vmatmul.msk.f32.gmra.mxu0 %vm300_vm0, %v242_v37  ;;  %v251_v36 = vld [vmem:[%s2672_s7 + $0xb8] sm:$0xff] }
  0x8b   : > { %2248 = vmatmul.msk.f32.gmra.mxu2 %vm300_vm0, %v275_v38  ;;  %2216 = vmatmul.msk.f32.gmra.mxu0 %vm300_vm0, %v243_v39 }
  0x90   : > { %v510_v41 = vpop.f32.mrf.mxu0 }
  0x91   : > { %v511_v44 = vadd.f32 %v2753_v40, %v510_v41 }
  0x93   : > { %v702_v45 = vmax.f32 %v511_v44, 0.0  ;;  %2249 = vmatmul.msk.f32.gmra.mxu2 %vm300_vm0, %v276_v42  ;;  %2217 = vmatmul.msk.f32.gmra.mxu0 %vm300_vm0, %v244_v43  ;;  %v284_v42 = vld [vmem:[%s2672_s7 + $0x1c0] sm:$0xff] }
  0x95   : > { %2265 = vmatmul.msk.f32.vlgmr.msra.gmra.mxu1 %vm300_vm0, %v702_v45  ;;  %v252_v45 = vld [vmem:[%s2672_s7 + $0xc0] sm:$0xff] }
  0x96   : > { %v606_v46 = vpop.f32.mrf.mxu2 }
  0x97   : > { %v607_v47 = vadd.f32 %v2753_v40, %v606_v46 }
  0x98   : > { %v513_v48 = vpop.f32.mrf.mxu0 }
  0x99   : > { %v734_v50 = vmax.f32 %v607_v47, 0.0  ;;  %v514_v51 = vadd.f32 %v2753_v40, %v513_v48 }
  0x9b   : > { %v703_v53 = vmax.f32 %v514_v51, 0.0  ;;  %2250 = vmatmul.msk.f32.gmra.mxu2 %vm300_vm0, %v277_v49  ;;  %2297 = vmatmul.msk.f32.vlgmr.msra.gmra.mxu3 %vm300_vm0, %v734_v50  ;;  %v285_v50 = vld [vmem:[%s2672_s7 + $0x1c8] sm:$0xff] }
  0x9c   : > { %2218 = vmatmul.msk.f32.gmra.mxu0 %vm300_vm0, %v245_v52 }
  0x9d   : > { %2266 = vmatmul.msk.f32.gmra.mxu1 %vm300_vm0, %v703_v53  ;;  %v253_v53 = vld [vmem:[%s2672_s7 + $0xc8] sm:$0xff] }
  0x9e   : > { %v609_v54 = vpop.f32.mrf.mxu2 }
  0x9f   : > { %v610_v55 = vadd.f32 %v2753_v40, %v609_v54 }
  0xa0   : > { %v516_v56 = vpop.f32.mrf.mxu0 }
  0xa1   : > { %v735_v58 = vmax.f32 %v610_v55, 0.0  ;;  %v517_v59 = vadd.f32 %v2753_v40, %v516_v56 }
  0xa3   : > { %v704_v61 = vmax.f32 %v517_v59, 0.0  ;;  %2251 = vmatmul.msk.f32.gmra.mxu2 %vm300_vm0, %v278_v57  ;;  %2298 = vmatmul.msk.f32.gmra.mxu3 %vm300_vm0, %v735_v58  ;;  %v286_v58 = vld [vmem:[%s2672_s7 + $0x1d0] sm:$0xff] }
  0xa4   : > { %2219 = vmatmul.msk.f32.gmra.mxu0 %vm300_vm0, %v246_v60 }
  0xa5   : > { %2267 = vmatmul.msk.f32.gmra.mxu1 %vm300_vm0, %v704_v61  ;;  %v254_v61 = vld [vmem:[%s2672_s7 + $0xd0] sm:$0xff] }
  0xa6   : > { %v612_v62 = vpop.f32.mrf.mxu2 }
  0xa7   : > { %v613_v63 = vadd.f32 %v2753_v40, %v612_v62 }
  0xa8   : > { %v519_v0 = vpop.f32.mrf.mxu0 }
  0xa9   : > { %v736_v2 = vmax.f32 %v613_v63, 0.0  ;;  %v520_v3 = vadd.f32 %v2753_v40, %v519_v0 }
  0xab   : > { %v705_v5 = vmax.f32 %v520_v3, 0.0  ;;  %2299 = vmatmul.msk.f32.gmra.mxu3 %vm300_vm0, %v736_v2  ;;  %2252 = vmatmul.msk.f32.gmra.mxu2 %vm300_vm0, %v279_v1  ;;  %v287_v2 = vld [vmem:[%s2672_s7 + $0x1d8] sm:$0xff] }
  0xac   : > { %2220 = vmatmul.msk.f32.gmra.mxu0 %vm300_vm0, %v247_v4 }
  0xad   : > { %2268 = vmatmul.msk.f32.gmra.mxu1 %vm300_vm0, %v705_v5 }
  0xae   : > { %v615_v6 = vpop.f32.mrf.mxu2 }
  0xaf   : > { %v616_v7 = vadd.f32 %v2753_v40, %v615_v6 }
  0xb0   : > { %v522_v8 = vpop.f32.mrf.mxu0 }
  0xb1   : > { %v737_v10 = vmax.f32 %v616_v7, 0.0  ;;  %v523_v11 = vadd.f32 %v2753_v40, %v522_v8  ;;  %v255_v7 = vld [vmem:[%s2672_s7 + $0xd8] sm:$0xff] }
  0xb3   : > { %v706_v13 = vmax.f32 %v523_v11, 0.0  ;;  %2300 = vmatmul.msk.f32.gmra.mxu3 %vm300_vm0, %v737_v10  ;;  %2253 = vmatmul.msk.f32.gmra.mxu2 %vm300_vm0, %v280_v9 }
  0xb4   : > { %2221 = vmatmul.msk.f32.gmra.mxu0 %vm300_vm0, %v248_v12  ;;  %v288_v12 = vld [vmem:[%s2672_s7 + $0x1e0] sm:$0xff] }
  0xb5   : > { %2269 = vmatmul.msk.f32.gmra.mxu1 %vm300_vm0, %v706_v13 }
  0xb6   : > { %v618_v14 = vpop.f32.mrf.mxu2 }
  0xb7   : > { %v619_v15 = vadd.f32 %v2753_v40, %v618_v14 }
  0xb8   : > { %v525_v16 = vpop.f32.mrf.mxu0 }
  0xb9   : > { %v738_v18 = vmax.f32 %v619_v15, 0.0  ;;  %v526_v19 = vadd.f32 %v2753_v40, %v525_v16  ;;  %v256_v15 = vld [vmem:[%s2672_s7 + $0xe0] sm:$0xff] }
  0xbb   : > { %2301 = vmatmul.msk.f32.gmra.mxu3 %vm300_vm0, %v738_v18  ;;  %v707_v21 = vmax.f32 %v526_v19, 0.0  ;;  %2254 = vmatmul.msk.f32.gmra.mxu2 %vm300_vm0, %v281_v17 }
  0xbc   : > { %2222 = vmatmul.msk.f32.gmra.mxu0 %vm300_vm0, %v249_v20  ;;  %v289_v20 = vld [vmem:[%s2672_s7 + $0x1e8] sm:$0xff] }
  0xbd   : > { %2270 = vmatmul.msk.f32.gmra.mxu1 %vm300_vm0, %v707_v21 }
  0xbe   : > { %v621_v22 = vpop.f32.mrf.mxu2 }
  0xbf   : > { %v622_v23 = vadd.f32 %v2753_v40, %v621_v22 }
  0xc0   : > { %v528_v24 = vpop.f32.mrf.mxu0 }
  0xc1   : > { %v739_v26 = vmax.f32 %v622_v23, 0.0  ;;  %v529_v27 = vadd.f32 %v2753_v40, %v528_v24  ;;  %v257_v23 = vld [vmem:[%s2672_s7 + $0xe8] sm:$0xff] }
  0xc3   : > { %2302 = vmatmul.msk.f32.gmra.mxu3 %vm300_vm0, %v739_v26  ;;  %v708_v29 = vmax.f32 %v529_v27, 0.0  ;;  %2255 = vmatmul.msk.f32.gmra.mxu2 %vm300_vm0, %v282_v25 }
  0xc4   : > { %2223 = vmatmul.msk.f32.gmra.mxu0 %vm300_vm0, %v250_v28  ;;  %v290_v28 = vld [vmem:[%s2672_s7 + $0x1f0] sm:$0xff] }
  0xc5   : > { %2271 = vmatmul.msk.f32.gmra.mxu1 %vm300_vm0, %v708_v29 }
  0xc6   : > { %v624_v30 = vpop.f32.mrf.mxu2 }
  0xc7   : > { %v625_v31 = vadd.f32 %v2753_v40, %v624_v30 }
  0xc8   : > { %v531_v32 = vpop.f32.mrf.mxu0 }
  0xc9   : > { %v740_v34 = vmax.f32 %v625_v31, 0.0  ;;  %v532_v35 = vadd.f32 %v2753_v40, %v531_v32 }
  0xcb   : > { %2303 = vmatmul.msk.f32.gmra.mxu3 %vm300_vm0, %v740_v34  ;;  %v709_v37 = vmax.f32 %v532_v35, 0.0  ;;  %2256 = vmatmul.msk.f32.gmra.mxu2 %vm300_vm0, %v283_v33 }
  0xcc   : > { %2224 = vmatmul.msk.f32.gmra.mxu0 %vm300_vm0, %v251_v36 }
  0xcd   : > { %2272 = vmatmul.msk.f32.gmra.mxu1 %vm300_vm0, %v709_v37  ;;  %v258_v37 = vld [vmem:[%s2672_s7 + $0xf0] sm:$0xff] }
  0xce   : > { %v627_v38 = vpop.f32.mrf.mxu2 }
  0xcf   : > { %v628_v39 = vadd.f32 %v2753_v40, %v627_v38 }
  0xd0   : > { %v534_v41 = vpop.f32.mrf.mxu0 }
  0xd1   : > { %v741_v43 = vmax.f32 %v628_v39, 0.0  ;;  %v535_v44 = vadd.f32 %v2753_v40, %v534_v41  ;;  %v2880_v39 = vld [vmem:[%s3854_s4] ss:$0 sm:$0xff] }
  0xd3   : > { %2304 = vmatmul.msk.f32.gmra.mxu3 %vm300_vm0, %v741_v43  ;;  %v710_v46 = vmax.f32 %v535_v44, 0.0  ;;  %2257 = vmatmul.msk.f32.gmra.mxu2 %vm300_vm0, %v284_v42 }
  0xd4   : > { %2225 = vmatmul.msk.f32.gmra.mxu0 %vm300_vm0, %v252_v45  ;;  %v291_v45 = vld [vmem:[%s2672_s7 + $0x1f8] sm:$0xff] }
  0xd5   : > { %2273 = vmatmul.msk.f32.gmra.mxu1 %vm300_vm0, %v710_v46 }
  0xd6   : > { %v630_v47 = vpop.f32.mrf.mxu2 }
  0xd7   : > { %v631_v48 = vadd.f32 %v2753_v40, %v630_v47 }
  0xd8   : > { %v537_v49 = vpop.f32.mrf.mxu0 }
  0xd9   : > { %v742_v51 = vmax.f32 %v631_v48, 0.0  ;;  %v538_v52 = vadd.f32 %v2753_v40, %v537_v49 }
  0xdb   : > { %2305 = vmatmul.msk.f32.gmra.mxu3 %vm300_vm0, %v742_v51  ;;  %v711_v54 = vmax.f32 %v538_v52, 0.0  ;;  %2258 = vmatmul.msk.f32.gmra.mxu2 %vm300_vm0, %v285_v50  ;;  %v259_v50 = vld [vmem:[%s2672_s7 + $0xf8] sm:$0xff] }
  0xdc   : > { %2226 = vmatmul.msk.f32.gmra.mxu0 %vm300_vm0, %v253_v53 }
  0xdd   : > { %2274 = vmatmul.msk.f32.gmra.mxu1 %vm300_vm0, %v711_v54 }
  0xde   : > { %v633_v55 = vpop.f32.mrf.mxu2 }
  0xdf   : > { %v634_v56 = vadd.f32 %v2753_v40, %v633_v55 }
  0xe0   : > { %v540_v57 = vpop.f32.mrf.mxu0 }
  0xe1   : > { %v743_v59 = vmax.f32 %v634_v56, 0.0  ;;  %v541_v60 = vadd.f32 %v2753_v40, %v540_v57 }
  0xe3   : > { %2306 = vmatmul.msk.f32.gmra.mxu3 %vm300_vm0, %v743_v59  ;;  %v712_v62 = vmax.f32 %v541_v60, 0.0  ;;  %2259 = vmatmul.msk.f32.gmra.mxu2 %vm300_vm0, %v286_v58 }
  0xe4   : > { %2227 = vmatmul.msk.f32.gmra.mxu0 %vm300_vm0, %v254_v61 }
  0xe5   : > { %2275 = vmatmul.msk.f32.gmra.mxu1 %vm300_vm0, %v712_v62 }
  0xe6   : > { %v636_v63 = vpop.f32.mrf.mxu2 }
  0xe7   : > { %v637_v0 = vadd.f32 %v2753_v40, %v636_v63 }
  0xe8   : > { %v543_v1 = vpop.f32.mrf.mxu0 }
  0xe9   : > { %v744_v3 = vmax.f32 %v637_v0, 0.0  ;;  %v544_v4 = vadd.f32 %v2753_v40, %v543_v1 }
  0xeb   : > { %2307 = vmatmul.msk.f32.gmra.mxu3 %vm300_vm0, %v744_v3  ;;  %v713_v5 = vmax.f32 %v544_v4, 0.0  ;;  %2260 = vmatmul.msk.f32.gmra.mxu2 %vm300_vm0, %v287_v2 }
  0xec   : > { %2228 = vmatmul.msk.f32.gmra.mxu0 %vm300_vm0, %v255_v7 }
  0xed   : > { %2276 = vmatmul.msk.f32.gmra.mxu1 %vm300_vm0, %v713_v5 }
  0xee   : > { %v639_v6 = vpop.f32.mrf.mxu2 }
  0xef   : > { %v640_v8 = vadd.f32 %v2753_v40, %v639_v6 }
  0xf0   : > { %v546_v9 = vpop.f32.mrf.mxu0 }
  0xf1   : > { %v745_v10 = vmax.f32 %v640_v8, 0.0  ;;  %v547_v11 = vadd.f32 %v2753_v40, %v546_v9 }
  0xf3   : > { %2308 = vmatmul.msk.f32.gmra.mxu3 %vm300_vm0, %v745_v10  ;;  %v714_v13 = vmax.f32 %v547_v11, 0.0  ;;  %2261 = vmatmul.msk.f32.gmra.mxu2 %vm300_vm0, %v288_v12 }
  0xf4   : > { %2229 = vmatmul.msk.f32.gmra.mxu0 %vm300_vm0, %v256_v15 }
  0xf5   : > { %2277 = vmatmul.msk.f32.gmra.mxu1 %vm300_vm0, %v714_v13 }
  0xf6   : > { %v642_v14 = vpop.f32.mrf.mxu2 }
  0xf7   : > { %v643_v16 = vadd.f32 %v2753_v40, %v642_v14 }
  0xf8   : > { %v549_v17 = vpop.f32.mrf.mxu0 }
  0xf9   : > { %v746_v18 = vmax.f32 %v643_v16, 0.0  ;;  %v550_v19 = vadd.f32 %v2753_v40, %v549_v17 }
  0xfb   : > { %2309 = vmatmul.msk.f32.gmra.mxu3 %vm300_vm0, %v746_v18  ;;  %v715_v21 = vmax.f32 %v550_v19, 0.0  ;;  %2262 = vmatmul.msk.f32.gmra.mxu2 %vm300_vm0, %v289_v20 }
  0xfc   : > { %2230 = vmatmul.msk.f32.gmra.mxu0 %vm300_vm0, %v257_v23 }
  0xfd   : > { %2278 = vmatmul.msk.f32.gmra.mxu1 %vm300_vm0, %v715_v21 }
  0xfe   : > { %v645_v22 = vpop.f32.mrf.mxu2 }
  0xff   : > { %v646_v24 = vadd.f32 %v2753_v40, %v645_v22 }
 0x100   : > { %v552_v25 = vpop.f32.mrf.mxu0 }
 0x101   : > { %v747_v26 = vmax.f32 %v646_v24, 0.0  ;;  %v553_v27 = vadd.f32 %v2753_v40, %v552_v25 }
 0x103   : > { %2310 = vmatmul.msk.f32.gmra.mxu3 %vm300_vm0, %v747_v26  ;;  %v716_v29 = vmax.f32 %v553_v27, 0.0  ;;  %2263 = vmatmul.msk.f32.gmra.mxu2 %vm300_vm0, %v290_v28 }
 0x104   : > { %2231 = vmatmul.msk.f32.gmra.mxu0 %vm300_vm0, %v258_v37 }
 0x105   : > { %2279 = vmatmul.msk.f32.gmra.mxu1 %vm300_vm0, %v716_v29 }
 0x106   : > { %v648_v30 = vpop.f32.mrf.mxu2 }
 0x107   : > { %v649_v31 = vadd.f32 %v2753_v40, %v648_v30 }
 0x108   : > { %v555_v32 = vpop.f32.mrf.mxu0 }
 0x109   : > { %v748_v33 = vmax.f32 %v649_v31, 0.0  ;;  %v556_v34 = vadd.f32 %v2753_v40, %v555_v32 }
 0x10b   : > { %2311 = vmatmul.msk.f32.gmra.mxu3 %vm300_vm0, %v748_v33  ;;  %v717_v35 = vmax.f32 %v556_v34, 0.0  ;;  %2264 = vmatmul.msk.f32.gmra.mxu2 %vm300_vm0, %v291_v45 }
 0x10c   : > { %2232 = vmatmul.msk.f32.gmra.mxu0 %vm300_vm0, %v259_v50 }
 0x10d   : > { %2280 = vmatmul.msk.f32.gmra.mxu1 %vm300_vm0, %v717_v35 }
 0x10e   : > { %v651_v36 = vpop.f32.mrf.mxu2 }
 0x10f   : > { %v652_v38 = vadd.f32 %v2753_v40, %v651_v36 }
 0x110   : > { %v558_v41 = vpop.f32.mrf.mxu0 }
 0x111   : > { %v749_v42 = vmax.f32 %v652_v38, 0.0  ;;  %v559_v43 = vadd.f32 %v2753_v40, %v558_v41 }
 0x112   : > { %v983_v44 = vpop.f32.mrf.mxu1 }
 0x113   : > { %2312 = vmatmul.msk.f32.gmra.mxu3 %vm300_vm0, %v749_v42  ;;  %v718_v46 = vmax.f32 %v559_v43, 0.0  ;;  %v2887_v47 = vadd.f32 %v2880_v39, %v983_v44 }
 0x115   : > { %v1176_v48 = vsel %vm1175_vm1, %v2887_v47, -inf  ;;  %2281 = vmatmul.msk.f32.gmra.mxu1 %vm300_vm0, %v718_v46 }
 0x116   : > { %v654_v49 = vpop.f32.mrf.mxu2  ;;  %1177 = vmax.xlane.f32.xlu0 %v1176_v48 }
 0x117   : > { %v655_v51 = vadd.f32 %v2753_v40, %v654_v49 }
 0x119   : > { %v750_v52 = vmax.f32 %v655_v51, 0.0  ;;  %v561_v53 = vpop.f32.mrf.mxu0 }
 0x11a   : > { %v986_v54 = vpop.f32.mrf.mxu1  ;;  %v562_v55 = vadd.f32 %v2753_v40, %v561_v53 }
 0x11b   : > { %v2898_v56 = vadd.f32 %v2880_v39, %v986_v54  ;;  %2313 = vmatmul.msk.f32.gmra.mxu3 %vm300_vm0, %v750_v52 }
 0x11c   : > { %v719_v57 = vmax.f32 %v562_v55, 0.0 }
 0x11d   : > { %v1179_v58 = vsel %vm1175_vm1, %v2898_v56, -inf }
 0x11e   : > { %v657_v59 = vpop.f32.mrf.mxu2  ;;  %v1079_v60 = vpop.f32.mrf.mxu3  ;;  %1180 = vmax.xlane.f32.xlu0 %v1179_v58  ;;  %2282 = vmatmul.msk.f32.gmra.mxu1 %vm300_vm0, %v719_v57 }
 0x11f   : > { %v658_v61 = vadd.f32 %v2753_v40, %v657_v59  ;;  %v2906_v62 = vadd.f32 %v2880_v39, %v1079_v60 }
 0x121   : > { %v751_v63 = vmax.f32 %v658_v61, 0.0  ;;  %v1272_v0 = vsel %vm1175_vm1, %v2906_v62, -inf  ;;  %v564_v1 = vpop.f32.mrf.mxu0 }
 0x122   : > { %1273 = vmax.xlane.f32.xlu2 %v1272_v0  ;;  %v989_v2 = vpop.f32.mrf.mxu1  ;;  %v565_v3 = vadd.f32 %v2753_v40, %v564_v1 }
 0x123   : > { %2314 = vmatmul.msk.f32.gmra.mxu3 %vm300_vm0, %v751_v63  ;;  %v2913_v4 = vadd.f32 %v2880_v39, %v989_v2 }
 0x124   : > { %v720_v5 = vmax.f32 %v565_v3, 0.0 }
 0x125   : > { %v1182_v6 = vsel %vm1175_vm1, %v2913_v4, -inf }
 0x126   : > { %v660_v7 = vpop.f32.mrf.mxu2  ;;  %v1082_v8 = vpop.f32.mrf.mxu3  ;;  %1183 = vmax.xlane.f32.xlu1 %v1182_v6  ;;  %2283 = vmatmul.msk.f32.gmra.mxu1 %vm300_vm0, %v720_v5 }
 0x127   : > { %v661_v9 = vadd.f32 %v2753_v40, %v660_v7  ;;  %v2920_v10 = vadd.f32 %v2880_v39, %v1082_v8 }
 0x129   : > { %v752_v11 = vmax.f32 %v661_v9, 0.0  ;;  %v1275_v12 = vsel %vm1175_vm1, %v2920_v10, -inf  ;;  %v567_v13 = vpop.f32.mrf.mxu0 }
 0x12a   : > { %v992_v14 = vpop.f32.mrf.mxu1  ;;  %1276 = vmax.xlane.f32.xlu0 %v1275_v12  ;;  %v568_v15 = vadd.f32 %v2753_v40, %v567_v13 }
 0x12b   : > { %v2926_v16 = vadd.f32 %v2880_v39, %v992_v14  ;;  %2315 = vmatmul.msk.f32.gmra.mxu3 %vm300_vm0, %v752_v11 }
 0x12c   : > { %v721_v17 = vmax.f32 %v568_v15, 0.0 }
 0x12d   : > { %v1185_v18 = vsel %vm1175_vm1, %v2926_v16, -inf }
 0x12e   : > { %v1085_v19 = vpop.f32.mrf.mxu3  ;;  %1186 = vmax.xlane.f32.xlu1 %v1185_v18  ;;  %v663_v20 = vpop.f32.mrf.mxu2  ;;  %2284 = vmatmul.msk.f32.gmra.mxu1 %vm300_vm0, %v721_v17 }
 0x12f   : > { %v664_v21 = vadd.f32 %v2753_v40, %v663_v20  ;;  %v2934_v22 = vadd.f32 %v2880_v39, %v1085_v19 }
 0x131   : > { %v753_v23 = vmax.f32 %v664_v21, 0.0  ;;  %v570_v24 = vpop.f32.mrf.mxu0  ;;  %v1278_v30 = vsel %vm1175_vm1, %v2934_v22, -inf }
 0x132   : > { %v995_v25 = vpop.f32.mrf.mxu1  ;;  %v571_v26 = vadd.f32 %v2753_v40, %v570_v24 }
 0x133   : > { %v2938_v27 = vadd.f32 %v2880_v39, %v995_v25  ;;  %2316 = vmatmul.msk.f32.gmra.mxu3 %vm300_vm0, %v753_v23 }
 0x134   : > { %v722_v28 = vmax.f32 %v571_v26, 0.0 }
 0x135   : > { %v1188_v29 = vsel %vm1175_vm1, %v2938_v27, -inf }
 0x136   : > { %v1088_v31 = vpop.f32.mrf.mxu3  ;;  %1189 = vmax.xlane.f32.xlu2 %v1188_v29  ;;  %1279 = vmax.xlane.f32.xlu1 %v1278_v30  ;;  %v666_v32 = vpop.f32.mrf.mxu2 }
 0x137   : > { %v667_v33 = vadd.f32 %v2753_v40, %v666_v32  ;;  %2285 = vmatmul.msk.f32.gmra.mxu1 %vm300_vm0, %v722_v28  ;;  %v2948_v34 = vadd.f32 %v2880_v39, %v1088_v31 }
 0x139   : > { %v754_v35 = vmax.f32 %v667_v33, 0.0  ;;  %v573_v36 = vpop.f32.mrf.mxu0  ;;  %v1281_v42 = vsel %vm1175_vm1, %v2948_v34, -inf }
 0x13a   : > { %v998_v37 = vpop.f32.mrf.mxu1  ;;  %v574_v38 = vadd.f32 %v2753_v40, %v573_v36 }
 0x13b   : > { %2317 = vmatmul.msk.f32.gmra.mxu3 %vm300_vm0, %v754_v35  ;;  %v2960_v48 = vadd.f32 %v2880_v39, %v998_v37 }
 0x13c   : > { %v723_v41 = vmax.f32 %v574_v38, 0.0 }
 0x13d   : > { %v1191_v57 = vsel %vm1175_vm1, %v2960_v48, -inf }
 0x13e   : > { %v1091_v43 = vpop.f32.mrf.mxu3  ;;  %1282 = vmax.xlane.f32.xlu2 %v1281_v42  ;;  %v669_v44 = vpop.f32.mrf.mxu2 }
 0x13f   : > { %v2955_v45 = vadd.f32 %v2880_v39, %v1091_v43  ;;  %v670_v46 = vadd.f32 %v2753_v40, %v669_v44  ;;  %2286 = vmatmul.msk.f32.gmra.mxu1 %vm300_vm0, %v723_v41 }
 0x141   : > { %v1284_v49 = vsel %vm1175_vm1, %v2955_v45, -inf  ;;  %v755_v50 = vmax.f32 %v670_v46, 0.0  ;;  %v576_v51 = vpop.f32.mrf.mxu0 }
 0x142   : > { %1285 = vmax.xlane.f32.xlu0 %v1284_v49  ;;  %v1001_v52 = vpop.f32.mrf.mxu1  ;;  %v577_v53 = vadd.f32 %v2753_v40, %v576_v51 }
 0x143   : > { %v2966_v54 = vadd.f32 %v2880_v39, %v1001_v52  ;;  %2318 = vmatmul.msk.f32.gmra.mxu3 %vm300_vm0, %v755_v50 }
 0x144   : > { %v724_v55 = vmax.f32 %v577_v53, 0.0 }
 0x145   : > { %v1194_v61 = vsel %vm1175_vm1, %v2966_v54, -inf }
 0x146   : > { %v1094_v58 = vpop.f32.mrf.mxu3  ;;  %1192 = vmax.xlane.f32.xlu2 %v1191_v57  ;;  %v672_v59 = vpop.f32.mrf.mxu2 }
 0x147   : > { %v2972_v60 = vadd.f32 %v2880_v39, %v1094_v58  ;;  %v673_v63 = vadd.f32 %v2753_v40, %v672_v59  ;;  %2287 = vmatmul.msk.f32.gmra.mxu1 %vm300_vm0, %v724_v55 }
 0x149   : > { %v1287_v0 = vsel %vm1175_vm1, %v2972_v60, -inf  ;;  %v756_v1 = vmax.f32 %v673_v63, 0.0  ;;  %v579_v2 = vpop.f32.mrf.mxu0 }
 0x14a   : > { %1288 = vmax.xlane.f32.xlu1 %v1287_v0  ;;  %1195 = vmax.xlane.f32.xlu0 %v1194_v61  ;;  %v1004_v3 = vpop.f32.mrf.mxu1  ;;  %v580_v5 = vadd.f32 %v2753_v40, %v579_v2 }
 0x14b   : > { %v2982_v6 = vadd.f32 %v2880_v39, %v1004_v3  ;;  %2319 = vmatmul.msk.f32.gmra.mxu3 %vm300_vm0, %v756_v1 }
 0x14c   : > { %v725_v7 = vmax.f32 %v580_v5, 0.0 }
 0x14d   : > { %v1197_v12 = vsel %vm1175_vm1, %v2982_v6, -inf }
 0x14e   : > { %v1097_v8 = vpop.f32.mrf.mxu3  ;;  %v675_v9 = vpop.f32.mrf.mxu2 }
 0x14f   : > { %v2986_v11 = vadd.f32 %v2880_v39, %v1097_v8  ;;  %v676_v13 = vadd.f32 %v2753_v40, %v675_v9  ;;  %2288 = vmatmul.msk.f32.gmra.mxu1 %vm300_vm0, %v725_v7 }
 0x151   : > { %v1290_v14 = vsel %vm1175_vm1, %v2986_v11, -inf  ;;  %v757_v15 = vmax.f32 %v676_v13, 0.0  ;;  %v582_v17 = vpop.f32.mrf.mxu0 }
 0x152   : > { %1291 = vmax.xlane.f32.xlu2 %v1290_v14  ;;  %1198 = vmax.xlane.f32.xlu1 %v1197_v12  ;;  %v1007_v18 = vpop.f32.mrf.mxu1  ;;  %v583_v19 = vadd.f32 %v2753_v40, %v582_v17 }
 0x153   : > { %v2996_v20 = vadd.f32 %v2880_v39, %v1007_v18  ;;  %2320 = vmatmul.msk.f32.gmra.mxu3 %vm300_vm0, %v757_v15 }
 0x154   : > { %v726_v21 = vmax.f32 %v583_v19, 0.0 }
 0x155   : > { %v1200_v26 = vsel %vm1175_vm1, %v2996_v20, -inf }
 0x156   : > { %v1100_v23 = vpop.f32.mrf.mxu3  ;;  %v678_v24 = vpop.f32.mrf.mxu2 }
 0x157   : > { %v3000_v25 = vadd.f32 %v2880_v39, %v1100_v23  ;;  %v679_v28 = vadd.f32 %v2753_v40, %v678_v24  ;;  %2289 = vmatmul.msk.f32.gmra.mxu1 %vm300_vm0, %v726_v21 }
 0x159   : > { %v1293_v29 = vsel %vm1175_vm1, %v3000_v25, -inf  ;;  %v758_v30 = vmax.f32 %v679_v28, 0.0  ;;  %v585_v31 = vpop.f32.mrf.mxu0 }
 0x15a   : > { %1201 = vmax.xlane.f32.xlu2 %v1200_v26  ;;  %1294 = vmax.xlane.f32.xlu0 %v1293_v29  ;;  %v1010_v32 = vpop.f32.mrf.mxu1  ;;  %v586_v33 = vadd.f32 %v2753_v40, %v585_v31 }
 0x15b   : > { %v3010_v35 = vadd.f32 %v2880_v39, %v1010_v32  ;;  %2321 = vmatmul.msk.f32.gmra.mxu3 %vm300_vm0, %v758_v30 }
 0x15c   : > { %v727_v36 = vmax.f32 %v586_v33, 0.0 }
 0x15d   : > { %v1203_v42 = vsel %vm1175_vm1, %v3010_v35, -inf }
 0x15e   : > { %v1103_v37 = vpop.f32.mrf.mxu3  ;;  %v681_v38 = vpop.f32.mrf.mxu2 }
 0x15f   : > { %v3014_v41 = vadd.f32 %v2880_v39, %v1103_v37  ;;  %v682_v43 = vadd.f32 %v2753_v40, %v681_v38  ;;  %2290 = vmatmul.msk.f32.gmra.mxu1 %vm300_vm0, %v727_v36 }
 0x161   : > { %v1296_v44 = vsel %vm1175_vm1, %v3014_v41, -inf  ;;  %v759_v46 = vmax.f32 %v682_v43, 0.0  ;;  %v588_v49 = vpop.f32.mrf.mxu0 }
 0x162   : > { %1297 = vmax.xlane.f32.xlu1 %v1296_v44  ;;  %1204 = vmax.xlane.f32.xlu0 %v1203_v42  ;;  %v1013_v50 = vpop.f32.mrf.mxu1  ;;  %v589_v51 = vadd.f32 %v2753_v40, %v588_v49 }
 0x163   : > { %v3024_v52 = vadd.f32 %v2880_v39, %v1013_v50  ;;  %2322 = vmatmul.msk.f32.gmra.mxu3 %vm300_vm0, %v759_v46 }
 0x164   : > { %v728_v53 = vmax.f32 %v589_v51, 0.0 }
 0x165   : > { %v1206_v59 = vsel %vm1175_vm1, %v3024_v52, -inf }
 0x166   : > { %v1106_v55 = vpop.f32.mrf.mxu3  ;;  %v684_v57 = vpop.f32.mrf.mxu2 }
 0x167   : > { %v3028_v58 = vadd.f32 %v2880_v39, %v1106_v55  ;;  %v685_v61 = vadd.f32 %v2753_v40, %v684_v57  ;;  %2291 = vmatmul.msk.f32.gmra.mxu1 %vm300_vm0, %v728_v53 }
 0x169   : > { %v1299_v63 = vsel %vm1175_vm1, %v3028_v58, -inf  ;;  %v760_v0 = vmax.f32 %v685_v61, 0.0  ;;  %v591_v3 = vpop.f32.mrf.mxu0 }
 0x16a   : > { %1300 = vmax.xlane.f32.xlu2 %v1299_v63  ;;  %1207 = vmax.xlane.f32.xlu1 %v1206_v59  ;;  %v1016_v1 = vpop.f32.mrf.mxu1  ;;  %v592_v5 = vadd.f32 %v2753_v40, %v591_v3 }
 0x16b   : > { %v3037_v2 = vadd.f32 %v2880_v39, %v1016_v1  ;;  %2323 = vmatmul.msk.f32.gmra.mxu3 %vm300_vm0, %v760_v0 }
 0x16c   : > { %v729_v14 = vmax.f32 %v592_v5, 0.0 }
 0x16d   : > { %v1209_v12 = vsel %vm1175_vm1, %v3037_v2, -inf }
 0x16e   : > { %v1109_v7 = vpop.f32.mrf.mxu3  ;;  %v687_v8 = vpop.f32.mrf.mxu2 }
 0x16f   : > { %v3042_v9 = vadd.f32 %v2880_v39, %v1109_v7  ;;  %v688_v13 = vadd.f32 %v2753_v40, %v687_v8  ;;  %2292 = vmatmul.msk.f32.gmra.mxu1 %vm300_vm0, %v729_v14 }
 0x171   : > { %v1302_v15 = vsel %vm1175_vm1, %v3042_v9, -inf  ;;  %v761_v17 = vmax.f32 %v688_v13, 0.0  ;;  %v594_v21 = vpop.f32.mrf.mxu0 }
 0x172   : > { %1210 = vmax.xlane.f32.xlu2 %v1209_v12  ;;  %1303 = vmax.xlane.f32.xlu0 %v1302_v15  ;;  %v1019_v18 = vpop.f32.mrf.mxu1  ;;  %v595_v23 = vadd.f32 %v2753_v40, %v594_v21 }
 0x173   : > { %v3051_v19 = vadd.f32 %v2880_v39, %v1019_v18  ;;  %2324 = vmatmul.msk.f32.gmra.mxu3 %vm300_vm0, %v761_v17 }
 0x174   : > { %v730_v30 = vmax.f32 %v595_v23, 0.0 }
 0x175   : > { %v1212_v29 = vsel %vm1175_vm1, %v3051_v19, -inf }
 0x176   : > { %v1112_v24 = vpop.f32.mrf.mxu3  ;;  %v690_v26 = vpop.f32.mrf.mxu2 }
 0x177   : > { %v3056_v28 = vadd.f32 %v2880_v39, %v1112_v24  ;;  %v691_v31 = vadd.f32 %v2753_v40, %v690_v26  ;;  %2293 = vmatmul.msk.f32.gmra.mxu1 %vm300_vm0, %v730_v30 }
 0x179   : > { %v1305_v32 = vsel %vm1175_vm1, %v3056_v28, -inf  ;;  %v762_v33 = vmax.f32 %v691_v31, 0.0  ;;  %v597_v38 = vpop.f32.mrf.mxu0 }
 0x17a   : > { %1306 = vmax.xlane.f32.xlu1 %v1305_v32  ;;  %1213 = vmax.xlane.f32.xlu0 %v1212_v29  ;;  %v1022_v36 = vpop.f32.mrf.mxu1  ;;  %v598_v42 = vadd.f32 %v2753_v40, %v597_v38 }
 0x17b   : > { %v3065_v37 = vadd.f32 %v2880_v39, %v1022_v36  ;;  %2325 = vmatmul.msk.f32.gmra.mxu3 %vm300_vm0, %v762_v33 }
 0x17c   : > { %v731_v50 = vmax.f32 %v598_v42, 0.0 }
 0x17d   : > { %v1215_v49 = vsel %vm1175_vm1, %v3065_v37, -inf }
 0x17e   : > { %v1115_v43 = vpop.f32.mrf.mxu3  ;;  %v693_v44 = vpop.f32.mrf.mxu2 }
 0x17f   : > { %v3070_v46 = vadd.f32 %v2880_v39, %v1115_v43  ;;  %v694_v51 = vadd.f32 %v2753_v40, %v693_v44  ;;  %2294 = vmatmul.msk.f32.gmra.mxu1 %vm300_vm0, %v731_v50 }
 0x181   : > { %v1308_v53 = vsel %vm1175_vm1, %v3070_v46, -inf  ;;  %v763_v55 = vmax.f32 %v694_v51, 0.0  ;;  %v600_v14 = vpop.f32.mrf.mxu0 }
 0x182   : > { %1309 = vmax.xlane.f32.xlu2 %v1308_v53  ;;  %1216 = vmax.xlane.f32.xlu1 %v1215_v49  ;;  %v1025_v57 = vpop.f32.mrf.mxu1  ;;  %v601_v17 = vadd.f32 %v2753_v40, %v600_v14 }
 0x183   : > { %v3079_v59 = vadd.f32 %v2880_v39, %v1025_v57  ;;  %2326 = vmatmul.msk.f32.gmra.mxu3 %vm300_vm0, %v763_v55 }
 0x184   : > { %v732_v23 = vmax.f32 %v601_v17, 0.0 }
 0x185   : > { %v1218_v1 = vsel %vm1175_vm1, %v3079_v59, -inf }
 0x186   : > { %v1118_v61 = vpop.f32.mrf.mxu3  ;;  %v696_v63 = vpop.f32.mrf.mxu2 }
 0x187   : > { %v3083_v0 = vadd.f32 %v2880_v39, %v1118_v61  ;;  %v697_v3 = vadd.f32 %v2753_v40, %v696_v63  ;;  %2295 = vmatmul.msk.f32.gmra.mxu1 %vm300_vm0, %v732_v23 }
 0x189   : > { %v1311_v5 = vsel %vm1175_vm1, %v3083_v0, -inf  ;;  %v764_v7 = vmax.f32 %v697_v3, 0.0  ;;  %v1178_v8 = vpop.xlane.xlu0 %1177  ;;  %v603_v36 = vpop.f32.mrf.mxu0 }
 0x18a   : > { %1219 = vmax.xlane.f32.xlu2 %v1218_v1  ;;  %1312 = vmax.xlane.f32.xlu0 %v1311_v5  ;;  %v1028_v12 = vpop.f32.mrf.mxu1  ;;  %v1368_v24 = vsub.f32 %v2887_v47, %v1178_v8  ;;  %v604_v42 = vadd.f32 %v2753_v40, %v603_v36 }
 0x18b   : > { %v3091_v13 = vadd.f32 %v2880_v39, %v1028_v12  ;;  %2327 = vmatmul.msk.f32.gmra.mxu3 %vm300_vm0, %v764_v7 }
 0x18c   : > { %v1432_v32 = vmul.f32 1.442695, %v1368_v24  ;;  %v733_v51 = vmax.f32 %v604_v42, 0.0 }
 0x18d   : > { %v1221_v21 = vsel %vm1175_vm1, %v3091_v13, -inf }
 0x18e   : > { %v1121_v15 = vpop.f32.mrf.mxu3  ;;  %v699_v49 = vpop.f32.mrf.mxu2  ;;  %2349 = vpow2.f32 %v1432_v32 }
 0x18f   : > { %v3096_v18 = vadd.f32 %v2880_v39, %v1121_v15  ;;  %v700_v53 = vadd.f32 %v2753_v40, %v699_v49  ;;  %2296 = vmatmul.msk.f32.gmra.mxu1 %vm300_vm0, %v733_v51 }
 0x191   : > { %v1314_v26 = vsel %vm1175_vm1, %v3096_v18, -inf  ;;  %v1181_v31 = vpop.xlane.xlu0 %1180 }
 0x192   : > { %1315 = vmax.xlane.f32.xlu1 %v1314_v26  ;;  %1222 = vmax.xlane.f32.xlu0 %v1221_v21  ;;  %v1031_v29 = vpop.f32.mrf.mxu1  ;;  %v1369_v47 = vsub.f32 %v2898_v56, %v1181_v31  ;;  %v765_v56 = vmax.f32 %v700_v53, 0.0 }
 0x193   : > { %v3104_v30 = vadd.f32 %v2880_v39, %v1031_v29 }
 0x194   : > { %v1434_v61 = vmul.f32 1.442695, %v1369_v47  ;;  %2328 = vmatmul.msk.f32.gmra.mxu3 %vm300_vm0, %v765_v56  ;;  %v3123_v5 = vpop.eup %2349 }
 0x195   : > { %v1274_v33 = vpop.xlane.xlu2 %1273  ;;  %v1224_v44 = vsel %vm1175_vm1, %v3104_v30, -inf  ;;  %v1560_v17 = vsel %vm1175_vm1, %v3123_v5, 0.0 }
 0x196   : > { %v1124_v38 = vpop.f32.mrf.mxu3  ;;  %v1400_v50 = vsub.f32 %v2906_v62, %v1274_v33  ;;  %2351 = vpow2.f32 %v1434_v61 }
 0x197   : > { %v3110_v43 = vadd.f32 %v2880_v39, %v1124_v38 }
 0x198   : > { %v1496_v1 = vmul.f32 1.442695, %v1400_v50 }
 0x199   : > { %v1184_v55 = vpop.xlane.xlu1 %1183  ;;  %v1317_v57 = vsel %vm1175_vm1, %v3110_v43, -inf }
 0x19a   : > { %1318 = vmax.xlane.f32.xlu2 %v1317_v57  ;;  %1225 = vmax.xlane.f32.xlu1 %v1224_v44  ;;  %2353 = vpow2.f32 %v1496_v1  ;;  %v1370_v31 = vsub.f32 %v2913_v4, %v1184_v55 }
 0x19b   : > { %v1034_v63 = vpop.f32.mrf.mxu1 }
 0x19c   : > { %v3120_v3 = vadd.f32 %v2880_v39, %v1034_v63  ;;  %v3135_v23 = vpop.eup %2351  ;;  %v1436_v47 = vmul.f32 1.442695, %v1370_v31 }
 0x19d   : > { %v1277_v62 = vpop.xlane.xlu0 %1276  ;;  %v1563_v38 = vsel %vm1175_vm1, %v3135_v23, 0.0 }
 0x19e   : > { %v1127_v40 = vpop.f32.mrf.mxu3  ;;  %v1227_v8 = vsel %vm1175_vm1, %v3120_v3, -inf  ;;  %v1401_v12 = vsub.f32 %v2920_v10, %v1277_v62 }
 0x19f   : > { %v3126_v7 = vadd.f32 %v2880_v39, %v1127_v40 }
 0x1a0   : > { %v1498_v24 = vmul.f32 1.442695, %v1401_v12  ;;  %v3137_v26 = vpop.eup %2353 }
 0x1a1   : > { %v1187_v14 = vpop.xlane.xlu1 %1186  ;;  %v1320_v15 = vsel %vm1175_vm1, %v3126_v7, -inf  ;;  %v1656_v33 = vsel %vm1175_vm1, %v3137_v26, 0.0 }
 0x1a2   : > { %1228 = vmax.xlane.f32.xlu2 %v1227_v8  ;;  %1321 = vmax.xlane.f32.xlu0 %v1320_v15  ;;  %2355 = vpow2.f32 %v1498_v24  ;;  %v1371_v57 = vsub.f32 %v2926_v16, %v1187_v14 }
 0x1a3   : > { %1561 = vadd.xlane.f32.xlu1 %v1560_v17  ;;  %v1037_v21 = vpop.f32.mrf.mxu1  ;;  %2357 = vpow2.f32 %v1436_v47 }
 0x1a4   : > { %v3151_v44 = vadd.f32 %v2880_v39, %v1037_v21  ;;  %v1438_v62 = vmul.f32 1.442695, %v1371_v57 }
 0x1a6   : > { %v1130_v29 = vpop.f32.mrf.mxu3 }
 0x1a7   : > { %v3141_v10 = vadd.f32 %v2880_v39, %v1130_v29 }
 0x1a8   : > { %v3153_v53 = vpop.eup %2355 }
 0x1a9   : > { %v1280_v32 = vpop.xlane.xlu1 %1279  ;;  %v1323_v36 = vsel %vm1175_vm1, %v3141_v10, -inf  ;;  %v1190_v4 = vpop.xlane.xlu2 %1189  ;;  %v1659_v61 = vsel %vm1175_vm1, %v3153_v53, 0.0 }
 0x1aa   : > { %v1402_v42 = vsub.f32 %v2934_v22, %v1280_v32  ;;  %1657 = vadd.xlane.f32.xlu0 %v1656_v33  ;;  %1564 = vadd.xlane.f32.xlu2 %v1563_v38  ;;  %v1230_v22 = vsel %vm1175_vm1, %v3151_v44, -inf  ;;  %v3168_v1 = vpop.eup %2357  ;;  %v1372_v16 = vsub.f32 %v2938_v27, %v1190_v4 }
 0x1ab   : > { %1324 = vmax.xlane.f32.xlu1 %v1323_v36  ;;  %v1040_v51 = vpop.f32.mrf.mxu1  ;;  %v1566_v21 = vsel %vm1175_vm1, %v3168_v1, 0.0 }
 0x1ac   : > { %v1500_v49 = vmul.f32 1.442695, %v1402_v42  ;;  %v3166_v63 = vadd.f32 %v2880_v39, %v1040_v51  ;;  %v1440_v29 = vmul.f32 1.442695, %v1372_v16 }
 0x1ae   : > { %v1133_v50 = vpop.f32.mrf.mxu3  ;;  %2359 = vpow2.f32 %v1500_v49  ;;  %v1233_v15 = vsel %vm1175_vm1, %v3166_v63, -inf }
 0x1af   : > { %v3156_v55 = vadd.f32 %v2880_v39, %v1133_v50  ;;  %2361 = vpow2.f32 %v1438_v62 }
 0x1b0   : > { %2363 = vpow2.f32 %v1440_v29 }
 0x1b1   : > { %v1326_v56 = vsel %vm1175_vm1, %v3156_v55, -inf  ;;  %v1283_v40 = vpop.xlane.xlu2 %1282 }
 0x1b2   : > { %1231 = vmax.xlane.f32.xlu0 %v1230_v22  ;;  %1327 = vmax.xlane.f32.xlu2 %v1326_v56  ;;  %v1403_v14 = vsub.f32 %v2948_v34, %v1283_v40 }
 0x1b3   : > { %1660 = vadd.xlane.f32.xlu1 %v1659_v61 }
 0x1b4   : > { %v3170_v8 = vpop.eup %2359  ;;  %v1043_v17 = vpop.f32.mrf.mxu1  ;;  %v1502_v34 = vmul.f32 1.442695, %v1403_v14 }
 0x1b5   : > { %v1662_v24 = vsel %vm1175_vm1, %v3170_v8, 0.0  ;;  %v3181_v31 = vadd.f32 %v2880_v39, %v1043_v17  ;;  %v1286_v32 = vpop.xlane.xlu0 %1285  ;;  %v3186_v36 = vpop.eup %2361 }
 0x1b6   : > { %v1136_v12 = vpop.f32.mrf.mxu3  ;;  %2365 = vpow2.f32 %v1502_v34  ;;  %v1404_v47 = vsub.f32 %v2955_v45, %v1286_v32  ;;  %v1569_v4 = vsel %vm1175_vm1, %v3186_v36, 0.0  ;;  %v3198_v22 = vpop.eup %2363 }
 0x1b7   : > { %v3184_v27 = vadd.f32 %v2880_v39, %v1136_v12  ;;  %v1236_v42 = vsel %vm1175_vm1, %v3181_v31, -inf  ;;  %v1572_v14 = vsel %vm1175_vm1, %v3198_v22, 0.0 }
 0x1b8   : > { %v1504_v57 = vmul.f32 1.442695, %v1404_v47 }
 0x1b9   : > { %v1329_v38 = vsel %vm1175_vm1, %v3184_v27, -inf  ;;  %v1193_v49 = vpop.xlane.xlu2 %1192 }
 0x1ba   : > { %1567 = vadd.xlane.f32.xlu0 %v1566_v21  ;;  %1663 = vadd.xlane.f32.xlu2 %v1662_v24  ;;  %v1373_v62 = vsub.f32 %v2960_v48, %v1193_v49  ;;  %2367 = vpow2.f32 %v1504_v57 }
 0x1bb   : > { %1234 = vmax.xlane.f32.xlu1 %v1233_v15 }
 0x1bc   : > { %v1046_v51 = vpop.f32.mrf.mxu1  ;;  %v3200_v61 = vpop.eup %2365  ;;  %v1442_v15 = vmul.f32 1.442695, %v1373_v62 }
 0x1bd   : > { %v1289_v56 = vpop.xlane.xlu1 %1288  ;;  %v1665_v16 = vsel %vm1175_vm1, %v3200_v61, 0.0  ;;  %v3211_v17 = vadd.f32 %v2880_v39, %v1046_v51  ;;  %v1196_v21 = vpop.xlane.xlu0 %1195 }
 0x1be   : > { %v1139_v33 = vpop.f32.mrf.mxu3  ;;  %v1405_v45 = vsub.f32 %v2972_v60, %v1289_v56  ;;  %2369 = vpow2.f32 %v1442_v15 }
 0x1bf   : > { %v3196_v50 = vadd.f32 %v2880_v39, %v1139_v33  ;;  %v1239_v34 = vsel %vm1175_vm1, %v3211_v17, -inf  ;;  %v1374_v33 = vsub.f32 %v2966_v54, %v1196_v21 }
 0x1c0   : > { %v1506_v60 = vmul.f32 1.442695, %v1405_v45  ;;  %v3216_v29 = vpop.eup %2367 }
 0x1c1   : > { %v1332_v40 = vsel %vm1175_vm1, %v3196_v50, -inf  ;;  %v1444_v51 = vmul.f32 1.442695, %v1374_v33 }
 0x1c2   : > { %1330 = vmax.xlane.f32.xlu0 %v1329_v38  ;;  %1237 = vmax.xlane.f32.xlu2 %v1236_v42  ;;  %2371 = vpow2.f32 %v1506_v60  ;;  %v1668_v38 = vsel %vm1175_vm1, %v3216_v29, 0.0 }
 0x1c3   : > { %1570 = vadd.xlane.f32.xlu1 %v1569_v4  ;;  %2373 = vpow2.f32 %v1444_v51 }
 0x1c4   : > { %v1049_v24 = vpop.f32.mrf.mxu1  ;;  %v3228_v49 = vpop.eup %2369 }
 0x1c5   : > { %v1292_v42 = vpop.xlane.xlu2 %1291  ;;  %v3226_v47 = vadd.f32 %v2880_v39, %v1049_v24  ;;  %v1199_v57 = vpop.xlane.xlu1 %1198 }
 0x1c6   : > { %v1142_v12 = vpop.f32.mrf.mxu3  ;;  %v1406_v62 = vsub.f32 %v2986_v11, %v1292_v42  ;;  %v1375_v54 = vsub.f32 %v2982_v6, %v1199_v57 }
 0x1c7   : > { %v3214_v48 = vadd.f32 %v2880_v39, %v1142_v12  ;;  %v1242_v45 = vsel %vm1175_vm1, %v3226_v47, -inf  ;;  %v1575_v12 = vsel %vm1175_vm1, %v3228_v49, 0.0 }
 0x1c8   : > { %v3230_v56 = vpop.eup %2371  ;;  %v1446_v11 = vmul.f32 1.442695, %v1375_v54 }
 0x1c9   : > { %v1335_v32 = vsel %vm1175_vm1, %v3214_v48, -inf  ;;  %v3246_v24 = vpop.eup %2373 }
 0x1ca   : > { %1666 = vadd.xlane.f32.xlu0 %v1665_v16  ;;  %1573 = vadd.xlane.f32.xlu2 %v1572_v14  ;;  %v1671_v16 = vsel %vm1175_vm1, %v3230_v56, 0.0  ;;  %v1508_v14 = vmul.f32 1.442695, %v1406_v62 }
 0x1cb   : > { %1333 = vmax.xlane.f32.xlu1 %v1332_v40 }
 0x1cc   : > { %v1052_v40 = vpop.f32.mrf.mxu1  ;;  %2375 = vpow2.f32 %v1508_v14 }
 0x1cd   : > { %v3241_v15 = vadd.f32 %v2880_v39, %v1052_v40  ;;  %v1295_v60 = vpop.xlane.xlu0 %1294  ;;  %2377 = vpow2.f32 %v1446_v11  ;;  %v1202_v33 = vpop.xlane.xlu2 %1201 }
 0x1ce   : > { %v1145_v4 = vpop.f32.mrf.mxu3  ;;  %v1376_v40 = vsub.f32 %v2996_v20, %v1202_v33 }
 0x1cf   : > { %v3244_v6 = vadd.f32 %v2880_v39, %v1145_v4  ;;  %v1578_v4 = vsel %vm1175_vm1, %v3246_v24, 0.0 }
 0x1d2   : > { %1240 = vmax.xlane.f32.xlu0 %v1239_v34  ;;  %1336 = vmax.xlane.f32.xlu2 %v1335_v32  ;;  %v1338_v34 = vsel %vm1175_vm1, %v3244_v6, -inf  ;;  %v1245_v32 = vsel %vm1175_vm1, %v3241_v15, -inf  ;;  %v3258_v62 = vpop.eup %2375 }
 0x1d3   : > { %1669 = vadd.xlane.f32.xlu1 %v1668_v38  ;;  %v1407_v38 = vsub.f32 %v3000_v25, %v1295_v60  ;;  %3876 = vst [vmem:[#allocation2_spill] sm:$0xff] %v3258_v62  ;;  %v1674_v60 = vsel %vm1175_vm1, %v3258_v62, 0.0 }
 0x1d4   : > { %v1055_v57 = vpop.f32.mrf.mxu1 }
 0x1d5   : > { %v1298_v42 = vpop.xlane.xlu1 %1297  ;;  %v1510_v54 = vmul.f32 1.442695, %v1407_v38  ;;  %v3271_v20 = vadd.f32 %v2880_v39, %v1055_v57 }
 0x1d6   : > { %v1148_v21 = vpop.f32.mrf.mxu3  ;;  %v1408_v25 = vsub.f32 %v3014_v41, %v1298_v42 }
 0x1d7   : > { %v3256_v51 = vadd.f32 %v2880_v39, %v1148_v21  ;;  %2379 = vpow2.f32 %v1510_v54 }
 0x1d8   : > { %v1512_v33 = vmul.f32 1.442695, %v1408_v25 }
 0x1da   : > { %1576 = vadd.xlane.f32.xlu0 %v1575_v12  ;;  %1672 = vadd.xlane.f32.xlu2 %v1671_v16  ;;  %v1205_v12 = vpop.xlane.xlu0 %1204  ;;  %v1341_v16 = vsel %vm1175_vm1, %v3256_v51, -inf }
 0x1db   : > { %1243 = vmax.xlane.f32.xlu1 %v1242_v45  ;;  %v3260_v45 = vpop.eup %2377 }
 0x1dc   : > { %3877 = vst [vmem:[#allocation3_spill] sm:$0xff] %v3260_v45  ;;  %v1581_v21 = vsel %vm1175_vm1, %v3260_v45, 0.0  ;;  %v1058_v38 = vpop.f32.mrf.mxu1 }
 0x1dd   : > { %v1301_v11 = vpop.xlane.xlu2 %1300  ;;  %v3276_v42 = vpop.eup %2379 }
 0x1de   : > { %v1151_v14 = vpop.f32.mrf.mxu3  ;;  %3878 = vst [vmem:[#allocation4_spill] sm:$0xff] %v3276_v42  ;;  %v1677_v57 = vsel %vm1175_vm1, %v3276_v42, 0.0 }
 0x1df   : > { %v3274_v41 = vadd.f32 %v2880_v39, %v1151_v14 }
 0x1e1   : > { %v1344_v54 = vsel %vm1175_vm1, %v3274_v41, -inf }
 0x1e2   : > { %1339 = vmax.xlane.f32.xlu0 %v1338_v34  ;;  %1246 = vmax.xlane.f32.xlu2 %v1245_v32  ;;  %v1448_v34 = vmul.f32 1.442695, %v1376_v40  ;;  %v1208_v32 = vpop.xlane.xlu1 %1207 }
 0x1e3   : > { %1579 = vadd.xlane.f32.xlu1 %v1578_v4  ;;  %v1248_v4 = vsel %vm1175_vm1, %v3271_v20, -inf }
 0x1e4   : > { %2381 = vpow2.f32 %v1448_v34 }
 0x1e5   : > { %2383 = vpow2.f32 %v1512_v33  ;;  %v1304_v40 = vpop.xlane.xlu0 %1303  ;;  %v1211_v25 = vpop.xlane.xlu2 %1210  ;;  %v1409_v33 = vsub.f32 %v3028_v58, %v1301_v11 }
 0x1ea   : > { %1675 = vadd.xlane.f32.xlu0 %v1674_v60  ;;  %1582 = vadd.xlane.f32.xlu2 %v1581_v21  ;;  %v3286_v60 = vadd.f32 %v2880_v39, %v1058_v38  ;;  %v1154_v21 = vpop.f32.mrf.mxu3  ;;  %v3288_v34 = vpop.eup %2381 }
 0x1eb   : > { %1342 = vmax.xlane.f32.xlu1 %v1341_v16  ;;  %v1377_v16 = vsub.f32 %v3010_v35, %v1205_v12  ;;  %3879 = vst [vmem:[#allocation5_spill] sm:$0xff] %v3288_v34  ;;  %v3290_v45 = vpop.eup %2383  ;;  %v1378_v35 = vsub.f32 %v3024_v52, %v1208_v32  ;;  %v3306_v58 = vadd.f32 %v2880_v39, %v1154_v21 }
 0x1ec   : > { %3880 = vst [vmem:[#allocation6_spill] sm:$0xff] %v3290_v45  ;;  %v1251_v12 = vsel %vm1175_vm1, %v3286_v60, -inf  ;;  %v1680_v38 = vsel %vm1175_vm1, %v3290_v45, 0.0 }
 0x1ed   : > { %v1307_v14 = vpop.xlane.xlu1 %1306  ;;  %v1450_v62 = vmul.f32 1.442695, %v1377_v16  ;;  %v1514_v16 = vmul.f32 1.442695, %v1409_v33  ;;  %3882 = vst [vmem:[#allocation8_spill] sm:$0xff] %v3306_v58 }
 0x1ef   : > { %2385 = vpow2.f32 %v1450_v62  ;;  %v1452_v62 = vmul.f32 1.442695, %v1378_v35 }
 0x1f0   : > { %2387 = vpow2.f32 %v1514_v16 }
 0x1f1   : > { %2389 = vpow2.f32 %v1452_v62 }
 0x1f2   : > { %1249 = vmax.xlane.f32.xlu0 %v1248_v4  ;;  %1345 = vmax.xlane.f32.xlu2 %v1344_v54  ;;  %v1061_v4 = vpop.f32.mrf.mxu1  ;;  %v1584_v54 = vsel %vm1175_vm1, %v3288_v34, 0.0  ;;  %v1157_v32 = vpop.f32.mrf.mxu3 }
 0x1f3   : > { %1678 = vadd.xlane.f32.xlu1 %v1677_v57  ;;  %v1214_v57 = vpop.xlane.xlu0 %1213  ;;  %v3303_v52 = vadd.f32 %v2880_v39, %v1061_v4  ;;  %v3322_v35 = vadd.f32 %v2880_v39, %v1157_v32 }
 0x1f5   : > { %v3300_v42 = vpop.xlane.xlu2 %1309  ;;  %3881 = vst [vmem:[#allocation7_spill] sm:$0xff] %v3303_v52  ;;  %v3308_v11 = vpop.xlane.xlu1 %1216  ;;  %v1254_v33 = vsel %vm1175_vm1, %v3303_v52, -inf }
 0x1f6   : > { %v3310_v34 = vpop.eup %2385  ;;  %3884 = vst [vmem:[#allocation10_spill] sm:$0xff] %v3322_v35 }
 0x1f7   : > { %3883 = vst [vmem:[#allocation9_spill] sm:$0xff] %v3310_v34  ;;  %v1587_v21 = vsel %vm1175_vm1, %v3310_v34, 0.0  ;;  %v3324_v16 = vpop.eup %2387 }
 0x1f8   : > { %3885 = vst [vmem:[#allocation11_spill] sm:$0xff] %v3324_v16  ;;  %v1683_v39 = vsel %vm1175_vm1, %v3324_v16, 0.0 }
 0x1fa   : > { %1585 = vadd.xlane.f32.xlu0 %v1584_v54  ;;  %1681 = vadd.xlane.f32.xlu2 %v1680_v38  ;;  %v1347_v54 = vsel %vm1175_vm1, %v3306_v58, -inf  ;;  %v1064_v38 = vpop.f32.mrf.mxu1 }
 0x1fb   : > { %1252 = vmax.xlane.f32.xlu1 %v1251_v12  ;;  %v1410_v12 = vsub.f32 %v3042_v9, %v1304_v40  ;;  %v3330_v9 = vpop.eup %2389  ;;  %v1379_v40 = vsub.f32 %v3037_v2, %v1211_v25  ;;  %v3343_v2 = vld [vmem:[%s3854_s4] ss:$0 sm:$0xff] }
 0x1fc   : > { %3886 = vst [vmem:[#allocation12_spill] sm:$0xff] %v3330_v9  ;;  %v1590_v32 = vsel %vm1175_vm1, %v3330_v9, 0.0 }
 0x1fd   : > { %v3317_v4 = vpop.xlane.xlu0 %1312  ;;  %v1516_v45 = vmul.f32 1.442695, %v1410_v12  ;;  %v3326_v58 = vpop.xlane.xlu2 %1219  ;;  %v1454_v12 = vmul.f32 1.442695, %v1379_v40 }
 0x1ff   : > { %2391 = vpow2.f32 %v1516_v45 }
 0x200   : > { %2393 = vpow2.f32 %v1454_v12 }
 0x202   : > { %1348 = vmax.xlane.f32.xlu0 %v1347_v54  ;;  %1255 = vmax.xlane.f32.xlu2 %v1254_v33  ;;  %v1411_v54 = vsub.f32 %v3056_v28, %v1307_v14  ;;  %v1350_v33 = vsel %vm1175_vm1, %v3322_v35, -inf  ;;  %v3346_v28 = vadd.f32 %v3343_v2, %v1064_v38  ;;  %v1067_v40 = vpop.f32.mrf.mxu1 }
 0x203   : > { %1588 = vadd.xlane.f32.xlu1 %v1587_v21  ;;  %v1160_v21 = vpop.f32.mrf.mxu3  ;;  %v3367_v9 = vadd.f32 %v3343_v2, %v1067_v40 }
 0x204   : > { %3887 = vst [vmem:[#allocation13_spill] sm:$0xff] %v3346_v28  ;;  %v3349_v45 = vadd.f32 %v3343_v2, %v1160_v21  ;;  %v1518_v25 = vmul.f32 1.442695, %v1411_v54  ;;  %v1380_v21 = vsub.f32 %v3051_v19, %v1214_v57 }
 0x205   : > { %v3328_v62 = vpop.xlane.xlu1 %1315  ;;  %v3351_v14 = vpop.xlane.xlu0 %1222  ;;  %3890 = vst [vmem:[#allocation16_spill] sm:$0xff] %v3367_v9  ;;  %v1260_v40 = vsel %vm1175_vm1, %v3367_v9, -inf }
 0x206   : > { %3888 = vst [vmem:[#allocation14_spill] sm:$0xff] %v3349_v45  ;;  %v1353_v38 = vsel %vm1175_vm1, %v3349_v45, -inf  ;;  %2395 = vpow2.f32 %v1518_v25  ;;  %v1456_v35 = vmul.f32 1.442695, %v1380_v21 }
 0x20a   : > { %1684 = vadd.xlane.f32.xlu0 %v1683_v39  ;;  %1591 = vadd.xlane.f32.xlu2 %v1590_v32  ;;  %v1257_v32 = vsel %vm1175_vm1, %v3346_v28, -inf  ;;  %v1412_v28 = vsub.f32 %v3070_v46, %v3300_v42 }
 0x20b   : > { %1351 = vmax.xlane.f32.xlu1 %v1350_v33  ;;  %v3357_v33 = vpop.eup %2391  ;;  %v1163_v34 = vpop.f32.mrf.mxu3 }
 0x20c   : > { %3889 = vst [vmem:[#allocation15_spill] sm:$0xff] %v3357_v33  ;;  %v1686_v54 = vsel %vm1175_vm1, %v3357_v33, 0.0  ;;  %v3369_v12 = vpop.eup %2393  ;;  %v1520_v21 = vmul.f32 1.442695, %v1412_v28 }
 0x20d   : > { %v3353_v16 = vpop.xlane.xlu2 %1318  ;;  %v3355_v39 = vpop.xlane.xlu1 %1225  ;;  %3891 = vst [vmem:[#allocation17_spill] sm:$0xff] %v3369_v12  ;;  %v1593_v46 = vsel %vm1175_vm1, %v3369_v12, 0.0 }
 0x20e   : > { %v3377_v19 = vpop.eup %2395 }
 0x20f   : > { %3892 = vst [vmem:[#allocation18_spill] sm:$0xff] %v3377_v19  ;;  %v1689_v42 = vsel %vm1175_vm1, %v3377_v19, 0.0 }
 0x212   : > { %1258 = vmax.xlane.f32.xlu0 %v1257_v32  ;;  %1354 = vmax.xlane.f32.xlu2 %v1353_v38  ;;  %v1381_v32 = vsub.f32 %v3065_v37, %v3308_v11  ;;  %v1070_v38 = vpop.f32.mrf.mxu1  ;;  %v3391_v37 = vadd.f32 %v3343_v2, %v1163_v34 }
 0x213   : > { %1687 = vadd.xlane.f32.xlu1 %v1686_v54  ;;  %v3388_v54 = vadd.f32 %v3343_v2, %v1070_v38  ;;  %v1166_v19 = vpop.f32.mrf.mxu3  ;;  %v1413_v38 = vsub.f32 %v3083_v0, %v3317_v4  ;;  %v1382_v0 = vsub.f32 %v3079_v59, %v3326_v58  ;;  %v1414_v58 = vsub.f32 %v3096_v18, %v3328_v62 }
 0x214   : > { %3894 = vst [vmem:[#allocation20_spill] sm:$0xff] %v3391_v37  ;;  %v1458_v11 = vmul.f32 1.442695, %v1381_v32 }
 0x215   : > { %v3373_v45 = vpop.xlane.xlu2 %1228  ;;  %v3375_v25 = vpop.xlane.xlu0 %1321  ;;  %3893 = vst [vmem:[#allocation19_spill] sm:$0xff] %v3388_v54  ;;  %v1263_v34 = vsel %vm1175_vm1, %v3388_v54, -inf }
 0x216   : > { %v1562_v57 = vpop.xlane.xlu1 %1561 }
 0x217   : > { %2397 = vrcp.f32 %v1562_v57 }
 0x218   : > { %2399 = vpow2.f32 %v1456_v35 }
 0x219   : > { %2401 = vpow2.f32 %v1520_v21 }
 0x21a   : > { %1594 = vadd.xlane.f32.xlu0 %v1593_v46  ;;  %1690 = vadd.xlane.f32.xlu2 %v1689_v42  ;;  %v1073_v59 = vpop.f32.mrf.mxu1 }
 0x21b   : > { %1261 = vmax.xlane.f32.xlu1 %v1260_v40  ;;  %v1356_v40 = vsel %vm1175_vm1, %v3391_v37, -inf  ;;  %v3438_v62 = vadd.f32 %v3343_v2, %v1073_v59 }
 0x21d   : > { %v2398_v33 = vpop.eup %2397  ;;  %v1565_v35 = vpop.xlane.xlu2 %1564 }
 0x21e   : > { %v1658_v28 = vpop.xlane.xlu0 %1657  ;;  %v1816_v9 = vmul.f32 %v2398_v33, %v1562_v57  ;;  %v3393_v12 = vpop.xlane.xlu1 %1324  ;;  %2403 = vrcp.f32 %v1565_v35 }
 0x21f   : > { %v3395_v46 = vpop.eup %2399  ;;  %2405 = vrcp.f32 %v1658_v28 }
 0x220   : > { %3895 = vst [vmem:[#allocation21_spill] sm:$0xff] %v3395_v46  ;;  %2407 = vpow2.f32 %v1458_v11  ;;  %v1880_v32 = vsub.f32 2.0, %v1816_v9  ;;  %v1596_v21 = vsel %vm1175_vm1, %v3395_v46, 0.0  ;;  %v3405_v42 = vpop.eup %2401 }
 0x222   : > { %v1944_v57 = vmul.f32 %v2398_v33, %v1880_v32  ;;  %1357 = vmax.xlane.f32.xlu0 %v1356_v40  ;;  %1264 = vmax.xlane.f32.xlu2 %v1263_v34  ;;  %v3418_v33 = vadd.f32 %v3343_v2, %v1166_v19  ;;  %v1522_v40 = vmul.f32 1.442695, %v1413_v38  ;;  %v1169_v38 = vpop.f32.mrf.mxu3 }
 0x223   : > { %1597 = vadd.xlane.f32.xlu1 %v1596_v21 }
 0x224   : > { %v2404_v9 = vpop.eup %2403  ;;  %v2008_v4 = vmul.f32 %v3123_v5, %v1944_v57  ;;  %v1460_v5 = vmul.f32 1.442695, %v1382_v0  ;;  %v3441_v0 = vadd.f32 %v3343_v2, %v1169_v38 }
 0x225   : > { %v2406_v11 = vpop.eup %2405  ;;  %v1817_v34 = vmul.f32 %v2404_v9, %v1565_v35  ;;  %v3420_v32 = vpop.xlane.xlu2 %1327  ;;  %v1359_v35 = vsel %vm1175_vm1, %v3418_v33, -inf }
 0x226   : > { %v3422_v46 = vpop.xlane.xlu0 %1231  ;;  %v3424_v37 = vpop.eup %2407  ;;  %2072 = vst.msk [vmem:[%s3412_s26] sm:$0xff] %vm1175_vm1, %v2008_v4  ;;  %v1848_v21 = vmul.f32 %v2406_v11, %v1658_v28  ;;  %v1692_v4 = vsel %vm1175_vm1, %v3405_v42, 0.0 }
 0x227   : > { %v1661_v54 = vpop.xlane.xlu1 %1660  ;;  %v1881_v52 = vsub.f32 2.0, %v1817_v34  ;;  %v1599_v28 = vsel %vm1175_vm1, %v3424_v37, 0.0 }
 0x228   : > { %2409 = vrcp.f32 %v1661_v54  ;;  %v1912_v19 = vsub.f32 2.0, %v1848_v21 }
 0x229   : > { %2411 = vpow2.f32 %v1522_v40  ;;  %v1945_v57 = vmul.f32 %v2404_v9, %v1881_v52  ;;  %v1524_v52 = vmul.f32 1.442695, %v1414_v58  ;;  %v1384_v58 = vsub.f32 %v3104_v30, %v3355_v39 }
 0x22a   : > { %v1976_v34 = vmul.f32 %v2406_v11, %v1912_v19  ;;  %1693 = vadd.xlane.f32.xlu0 %v1692_v4  ;;  %1600 = vadd.xlane.f32.xlu2 %v1599_v28  ;;  %2413 = vpow2.f32 %v1460_v5  ;;  %v1383_v19 = vsub.f32 %v3091_v13, %v3351_v14  ;;  %v1362_v5 = vsel %vm1175_vm1, %v3441_v0, -inf  ;;  %v1076_v14 = vpop.f32.mrf.mxu1 }
 0x22b   : > { %v2009_v18 = vmul.f32 %v3135_v23, %v1945_v57  ;;  %1360 = vmax.xlane.f32.xlu1 %v1359_v35  ;;  %v1415_v39 = vsub.f32 %v3110_v43, %v3353_v16  ;;  %v1417_v43 = vsub.f32 %v3141_v10, %v3393_v12 }
 0x22c   : > { %v2040_v9 = vmul.f32 %v3137_v26, %v1976_v34  ;;  %v1266_v26 = vsel %vm1175_vm1, %v3438_v62, -inf  ;;  %v1462_v38 = vmul.f32 1.442695, %v1383_v19  ;;  %v1464_v34 = vmul.f32 1.442695, %v1384_v58 }
 0x22d   : > { %2073 = vst.msk [vmem:[%s3412_s26 + $0x8] sm:$0xff] %vm1175_vm1, %v2009_v18  ;;  %v1664_v21 = vpop.xlane.xlu2 %1663 }
 0x22e   : > { %v2410_v40 = vpop.eup %2409  ;;  %v1568_v11 = vpop.xlane.xlu0 %1567  ;;  %2104 = vst.msk [vmem:[%s3412_s26 + $0x100] sm:$0xff] %vm1175_vm1, %v2040_v9  ;;  %2415 = vrcp.f32 %v1664_v21 }
 0x22f   : > { %v1849_v23 = vmul.f32 %v2410_v40, %v1661_v54  ;;  %v3450_v59 = vpop.xlane.xlu1 %1234  ;;  %v3452_v35 = vpop.eup %2411  ;;  %2417 = vrcp.f32 %v1568_v11 }
 0x230   : > { %2419 = vpow2.f32 %v1524_v52  ;;  %v1695_v57 = vsel %vm1175_vm1, %v3452_v35, 0.0  ;;  %v3462_v4 = vpop.eup %2413  ;;  %v3466_v52 = vadd.f32 %v3343_v2, %v1076_v14  ;;  %v1526_v14 = vmul.f32 1.442695, %v1415_v39 }
 0x231   : > { %v1913_v13 = vsub.f32 2.0, %v1849_v23  ;;  %2421 = vpow2.f32 %v1462_v38  ;;  %v1602_v58 = vsel %vm1175_vm1, %v3462_v4, 0.0 }
 0x232   : > { %1267 = vmax.xlane.f32.xlu0 %v1266_v26  ;;  %1363 = vmax.xlane.f32.xlu2 %v1362_v5 }
 0x233   : > { %v1977_v54 = vmul.f32 %v2410_v40, %v1913_v13  ;;  %1696 = vadd.xlane.f32.xlu1 %v1695_v57  ;;  %v1172_v13 = vpop.f32.mrf.mxu3 }
 0x234   : > { %v2416_v28 = vpop.eup %2415  ;;  %v3490_v12 = vadd.f32 %v3343_v2, %v1172_v13 }
 0x235   : > { %v2041_v18 = vmul.f32 %v3153_v53, %v1977_v54  ;;  %v2418_v30 = vpop.eup %2417  ;;  %v1850_v9 = vmul.f32 %v2416_v28, %v1664_v21  ;;  %v3470_v40 = vpop.xlane.xlu2 %1237  ;;  %v1269_v21 = vsel %vm1175_vm1, %v3466_v52, -inf }
 0x236   : > { %v3472_v19 = vpop.xlane.xlu0 %1330  ;;  %v3474_v23 = vpop.eup %2419  ;;  %v1818_v26 = vmul.f32 %v2418_v30, %v1568_v11  ;;  %v1416_v11 = vsub.f32 %v3126_v7, %v3375_v25 }
 0x237   : > { %2105 = vst.msk [vmem:[%s3412_s26 + $0x108] sm:$0xff] %vm1175_vm1, %v2041_v18  ;;  %v1571_v5 = vpop.xlane.xlu1 %1570  ;;  %v1914_v53 = vsub.f32 2.0, %v1850_v9  ;;  %v1698_v54 = vsel %vm1175_vm1, %v3474_v23, 0.0  ;;  %v1530_v18 = vmul.f32 1.442695, %v1417_v43  ;;  %v1386_v43 = vsub.f32 %v3151_v44, %v3422_v46 }
 0x238   : > { %2423 = vrcp.f32 %v1571_v5  ;;  %v1882_v16 = vsub.f32 2.0, %v1818_v26  ;;  %v1528_v25 = vmul.f32 1.442695, %v1416_v11 }
 0x239   : > { %2425 = vpow2.f32 %v1464_v34  ;;  %v1978_v38 = vmul.f32 %v2416_v28, %v1914_v53  ;;  %v3492_v34 = vpop.eup %2421  ;;  %v1387_v53 = vsub.f32 %v3166_v63, %v3450_v59  ;;  %v1418_v59 = vsub.f32 %v3156_v55, %v3420_v32 }
 0x23a   : > { %v1946_v57 = vmul.f32 %v2418_v30, %v1882_v16  ;;  %1603 = vadd.xlane.f32.xlu0 %v1602_v58  ;;  %1699 = vadd.xlane.f32.xlu2 %v1698_v54  ;;  %2427 = vpow2.f32 %v1526_v14  ;;  %v1605_v16 = vsel %vm1175_vm1, %v3492_v34, 0.0  ;;  %v1468_v14 = vmul.f32 1.442695, %v1386_v43 }
 0x23b   : > { %v2042_v10 = vmul.f32 %v3170_v8, %v1978_v38  ;;  %1270 = vmax.xlane.f32.xlu1 %v1269_v21  ;;  %v1385_v8 = vsub.f32 %v3120_v3, %v3373_v45  ;;  %v1470_v13 = vmul.f32 1.442695, %v1387_v53 }
 0x23c   : > { %v2010_v39 = vmul.f32 %v3168_v1, %v1946_v57  ;;  %v1365_v1 = vsel %vm1175_vm1, %v3490_v12, -inf }
 0x23d   : > { %2106 = vst.msk [vmem:[%s3412_s26 + $0x110] sm:$0xff] %vm1175_vm1, %v2042_v10  ;;  %v1574_v28 = vpop.xlane.xlu2 %1573  ;;  %v1466_v45 = vmul.f32 1.442695, %v1385_v8 }
 0x23e   : > { %v2424_v7 = vpop.eup %2423  ;;  %v1667_v30 = vpop.xlane.xlu0 %1666  ;;  %2074 = vst.msk [vmem:[%s3412_s26 + $0x10] sm:$0xff] %vm1175_vm1, %v2010_v39  ;;  %2429 = vrcp.f32 %v1574_v28 }
 0x23f   : > { %v3497_v9 = vpop.eup %2425  ;;  %v1819_v2 = vmul.f32 %v2424_v7, %v1571_v5  ;;  %v1334_v26 = vpop.xlane.xlu1 %1333  ;;  %2431 = vrcp.f32 %v1667_v30 }
 0x240   : > { %2433 = vpow2.f32 %v1530_v18  ;;  %v1608_v3 = vsel %vm1175_vm1, %v3497_v9, 0.0  ;;  %v3513_v21 = vpop.eup %2427  ;;  %v1420_v32 = vsub.f32 %v3196_v50, %v1334_v26 }
 0x241   : > { %v1883_v58 = vsub.f32 2.0, %v1819_v2  ;;  %2435 = vpow2.f32 %v1528_v25  ;;  %v1701_v55 = vsel %vm1175_vm1, %v3513_v21, 0.0 }
 0x242   : > { %1366 = vmax.xlane.f32.xlu0 %v1365_v1  ;;  %1609 = vadd.xlane.f32.xlu2 %v1608_v3  ;;  %2437 = vpow2.f32 %v1466_v45  ;;  %v1536_v26 = vmul.f32 1.442695, %v1420_v32 }
 0x243   : > { %v1947_v5 = vmul.f32 %v2424_v7, %v1883_v58  ;;  %1606 = vadd.xlane.f32.xlu1 %v1605_v16 }
 0x244   : > { %v2430_v63 = vpop.eup %2429 }
 0x245   : > { %v2011_v44 = vmul.f32 %v3186_v36, %v1947_v5  ;;  %v2432_v46 = vpop.eup %2431  ;;  %v1820_v11 = vmul.f32 %v2430_v63, %v1574_v28  ;;  %v3518_v38 = vpop.xlane.xlu2 %1336  ;;  %v1532_v36 = vmul.f32 1.442695, %v1418_v59  ;;  %v1419_v28 = vsub.f32 %v3184_v27, %v3472_v19 }
 0x246   : > { %v1241_v54 = vpop.xlane.xlu0 %1240  ;;  %v3520_v57 = vpop.eup %2433  ;;  %v1851_v10 = vmul.f32 %v2432_v46, %v1667_v30  ;;  %v1388_v5 = vsub.f32 %v3181_v31, %v3470_v40 }
 0x247   : > { %2075 = vst.msk [vmem:[%s3412_s26 + $0x18] sm:$0xff] %vm1175_vm1, %v2011_v44  ;;  %v1670_v18 = vpop.xlane.xlu1 %1669  ;;  %v3524_v39 = vpop.eup %2435  ;;  %v1884_v7 = vsub.f32 2.0, %v1820_v11  ;;  %v1707_v30 = vsel %vm1175_vm1, %v3520_v57, 0.0  ;;  %v1534_v19 = vmul.f32 1.442695, %v1419_v28 }
 0x248   : > { %2439 = vrcp.f32 %v1670_v18  ;;  %v1915_v25 = vsub.f32 2.0, %v1851_v10  ;;  %v1704_v1 = vsel %vm1175_vm1, %v3524_v39, 0.0  ;;  %v3536_v50 = vpop.eup %2437  ;;  %v1472_v40 = vmul.f32 1.442695, %v1388_v5 }
 0x249   : > { %2441 = vpow2.f32 %v1470_v13  ;;  %v1948_v8 = vmul.f32 %v2430_v63, %v1884_v7  ;;  %v1389_v13 = vsub.f32 %v3211_v17, %v1241_v54  ;;  %v1611_v44 = vsel %vm1175_vm1, %v3536_v50, 0.0 }
 0x24a   : > { %2443 = vpow2.f32 %v1468_v14  ;;  %v1979_v2 = vmul.f32 %v2432_v46, %v1915_v25  ;;  %1702 = vadd.xlane.f32.xlu0 %v1701_v55  ;;  %1708 = vadd.xlane.f32.xlu2 %v1707_v30 }
 0x24b   : > { %v2012_v53 = vmul.f32 %v3198_v22, %v1948_v8  ;;  %1705 = vadd.xlane.f32.xlu1 %v1704_v1  ;;  %2445 = vpow2.f32 %v1532_v36 }
 0x24c   : > { %v2043_v58 = vmul.f32 %v3200_v61, %v1979_v2 }
 0x24d   : > { %2076 = vst.msk [vmem:[%s3412_s26 + $0x20] sm:$0xff] %vm1175_vm1, %v2012_v53  ;;  %v1673_v43 = vpop.xlane.xlu2 %1672 }
 0x24e   : > { %v2440_v27 = vpop.eup %2439  ;;  %v1577_v3 = vpop.xlane.xlu0 %1576  ;;  %2107 = vst.msk [vmem:[%s3412_s26 + $0x118] sm:$0xff] %vm1175_vm1, %v2043_v58  ;;  %2447 = vrcp.f32 %v1673_v43 }
 0x24f   : > { %v3541_v45 = vpop.eup %2441  ;;  %v1852_v22 = vmul.f32 %v2440_v27, %v1670_v18  ;;  %v1244_v16 = vpop.xlane.xlu1 %1243  ;;  %2449 = vrcp.f32 %v1577_v3  ;;  %v1474_v18 = vmul.f32 1.442695, %v1389_v13 }
 0x250   : > { %v3547_v63 = vpop.eup %2443  ;;  %2451 = vpow2.f32 %v1536_v26  ;;  %v1390_v59 = vsub.f32 %v3226_v47, %v1244_v16  ;;  %v1617_v31 = vsel %vm1175_vm1, %v3541_v45, 0.0 }
 0x251   : > { %v1916_v61 = vsub.f32 2.0, %v1852_v22  ;;  %2453 = vpow2.f32 %v1534_v19  ;;  %v1614_v14 = vsel %vm1175_vm1, %v3547_v63, 0.0  ;;  %v3557_v11 = vpop.eup %2445 }
 0x252   : > { %1612 = vadd.xlane.f32.xlu0 %v1611_v44  ;;  %1618 = vadd.xlane.f32.xlu2 %v1617_v31  ;;  %v1476_v54 = vmul.f32 1.442695, %v1390_v59  ;;  %2455 = vpow2.f32 %v1472_v40  ;;  %v1710_v1 = vsel %vm1175_vm1, %v3557_v11, 0.0 }
 0x253   : > { %v1980_v46 = vmul.f32 %v2440_v27, %v1916_v61  ;;  %1615 = vadd.xlane.f32.xlu1 %v1614_v14 }
 0x254   : > { %v2448_v47 = vpop.eup %2447 }
 0x255   : > { %v2044_v17 = vmul.f32 %v3216_v29, %v1980_v46  ;;  %v2450_v10 = vpop.eup %2449  ;;  %v1853_v7 = vmul.f32 %v2448_v47, %v1673_v43  ;;  %v1247_v55 = vpop.xlane.xlu2 %1246  ;;  %v1421_v29 = vsub.f32 %v3214_v48, %v3518_v38 }
 0x256   : > { %v1340_v36 = vpop.xlane.xlu0 %1339  ;;  %v3560_v32 = vpop.eup %2451  ;;  %v1821_v25 = vmul.f32 %v2450_v10, %v1577_v3 }
 0x257   : > { %2108 = vst.msk [vmem:[%s3412_s26 + $0x120] sm:$0xff] %vm1175_vm1, %v2044_v17  ;;  %v1580_v28 = vpop.xlane.xlu1 %1579  ;;  %v3564_v8 = vpop.eup %2453  ;;  %v1917_v30 = vsub.f32 2.0, %v1853_v7  ;;  %v1422_v26 = vsub.f32 %v3244_v6, %v1340_v36  ;;  %v1716_v58 = vsel %vm1175_vm1, %v3560_v32, 0.0  ;;  %v1538_v43 = vmul.f32 1.442695, %v1421_v29 }
 0x258   : > { %2457 = vrcp.f32 %v1580_v28  ;;  %v1885_v2 = vsub.f32 2.0, %v1821_v25  ;;  %v1713_v48 = vsel %vm1175_vm1, %v3564_v8, 0.0  ;;  %v3576_v19 = vpop.eup %2455 }
 0x259   : > { %2459 = vpow2.f32 %v1476_v54  ;;  %v1981_v53 = vmul.f32 %v2448_v47, %v1917_v30  ;;  %v1540_v6 = vmul.f32 1.442695, %v1422_v26  ;;  %v1620_v46 = vsel %vm1175_vm1, %v3576_v19, 0.0 }
 0x25a   : > { %2461 = vpow2.f32 %v1474_v18  ;;  %v1949_v27 = vmul.f32 %v2450_v10, %v1885_v2  ;;  %1711 = vadd.xlane.f32.xlu0 %v1710_v1  ;;  %1717 = vadd.xlane.f32.xlu2 %v1716_v58 }
 0x25b   : > { %v2045_v38 = vmul.f32 %v3230_v56, %v1981_v53  ;;  %1714 = vadd.xlane.f32.xlu1 %v1713_v48 }
 0x25c   : > { %v2013_v3 = vmul.f32 %v3228_v49, %v1949_v27  ;;  %v1391_v49 = vsub.f32 %v3241_v15, %v1247_v55 }
 0x25d   : > { %2109 = vst.msk [vmem:[%s3412_s26 + $0x128] sm:$0xff] %vm1175_vm1, %v2045_v38  ;;  %v1583_v22 = vpop.xlane.xlu2 %1582 }
 0x25e   : > { %v2458_v5 = vpop.eup %2457  ;;  %v1676_v16 = vpop.xlane.xlu0 %1675  ;;  %2077 = vst.msk [vmem:[%s3412_s26 + $0x28] sm:$0xff] %vm1175_vm1, %v2013_v3  ;;  %2463 = vrcp.f32 %v1583_v22  ;;  %v1478_v15 = vmul.f32 1.442695, %v1391_v49 }
 0x25f   : > { %v3581_v61 = vpop.eup %2459  ;;  %v1822_v59 = vmul.f32 %v2458_v5, %v1580_v28  ;;  %v1343_v13 = vpop.xlane.xlu1 %1342  ;;  %2465 = vrcp.f32 %v1676_v16 }
 0x260   : > { %v3585_v56 = vpop.eup %2461  ;;  %v1423_v44 = vsub.f32 %v3256_v51, %v1343_v13  ;;  %2467 = vpow2.f32 %v1538_v43  ;;  %v1626_v14 = vsel %vm1175_vm1, %v3581_v61, 0.0  ;;  %v3896_v43 = vld [vmem:[#allocation3_spill] sm:$0xff] }
 0x261   : > { %v1886_v31 = vsub.f32 2.0, %v1822_v59  ;;  %2469 = vpow2.f32 %v1540_v6  ;;  %v1623_v51 = vsel %vm1175_vm1, %v3585_v56, 0.0 }
 0x262   : > { %v1542_v40 = vmul.f32 1.442695, %v1423_v44  ;;  %1621 = vadd.xlane.f32.xlu0 %v1620_v46  ;;  %1627 = vadd.xlane.f32.xlu2 %v1626_v14 }
 0x263   : > { %v1950_v47 = vmul.f32 %v2458_v5, %v1886_v31  ;;  %1624 = vadd.xlane.f32.xlu1 %v1623_v51 }
 0x264   : > { %2471 = vpow2.f32 %v1542_v40  ;;  %v2464_v17 = vpop.eup %2463 }
 0x265   : > { %v2014_v54 = vmul.f32 %v3246_v24, %v1950_v47  ;;  %v2466_v10 = vpop.eup %2465  ;;  %v1823_v18 = vmul.f32 %v2464_v17, %v1583_v22  ;;  %v1346_v7 = vpop.xlane.xlu2 %1345 }
 0x266   : > { %v1250_v55 = vpop.xlane.xlu0 %1249  ;;  %v3596_v36 = vpop.eup %2467  ;;  %v1854_v25 = vmul.f32 %v2466_v10, %v1676_v16  ;;  %v1424_v24 = vsub.f32 %v3274_v41, %v1346_v7  ;;  %v3897_v41 = vld [vmem:[#allocation2_spill] sm:$0xff] }
 0x267   : > { %2078 = vst.msk [vmem:[%s3412_s26 + $0x30] sm:$0xff] %vm1175_vm1, %v2014_v54  ;;  %v1679_v28 = vpop.xlane.xlu1 %1678  ;;  %v1392_v30 = vsub.f32 %v3271_v20, %v1250_v55  ;;  %v3601_v29 = vpop.eup %2469  ;;  %v1887_v2 = vsub.f32 2.0, %v1823_v18  ;;  %v1719_v27 = vsel %vm1175_vm1, %v3596_v36, 0.0  ;;  %v3898_v54 = vld [vmem:[#allocation4_spill] sm:$0xff] }
 0x268   : > { %2473 = vrcp.f32 %v1679_v28  ;;  %v1918_v1 = vsub.f32 2.0, %v1854_v25  ;;  %v1722_v38 = vsel %vm1175_vm1, %v3601_v29, 0.0  ;;  %v1544_v6 = vmul.f32 1.442695, %v1424_v24  ;;  %v3900_v24 = vld [vmem:[#allocation8_spill] sm:$0xff] }
 0x269   : > { %2475 = vpow2.f32 %v1478_v15  ;;  %v1480_v53 = vmul.f32 1.442695, %v1392_v30  ;;  %v1951_v58 = vmul.f32 %v2464_v17, %v1887_v2  ;;  %v3899_v30 = vld [vmem:[#allocation7_spill] sm:$0xff] }
 0x26a   : > { %v3604_v26 = vpop.eup %2471  ;;  %v1982_v48 = vmul.f32 %v2466_v10, %v1918_v1  ;;  %1720 = vadd.xlane.f32.xlu0 %v1719_v27 }
 0x26b   : > { %v1725_v20 = vsel %vm1175_vm1, %v3604_v26, 0.0  ;;  %v2015_v3 = vmul.f32 %v3896_v43, %v1951_v58  ;;  %2477 = vpow2.f32 %v1480_v53  ;;  %1723 = vadd.xlane.f32.xlu1 %v1722_v38 }
 0x26c   : > { %1726 = vadd.xlane.f32.xlu2 %v1725_v20  ;;  %v2046_v5 = vmul.f32 %v3897_v41, %v1982_v48 }
 0x26d   : > { %2079 = vst.msk [vmem:[%s3412_s26 + $0x38] sm:$0xff] %vm1175_vm1, %v2015_v3  ;;  %v1682_v16 = vpop.xlane.xlu2 %1681 }
 0x26e   : > { %v2474_v22 = vpop.eup %2473  ;;  %v1586_v59 = vpop.xlane.xlu0 %1585  ;;  %2110 = vst.msk [vmem:[%s3412_s26 + $0x130] sm:$0xff] %vm1175_vm1, %v2046_v5  ;;  %2479 = vrcp.f32 %v1682_v16 }
 0x26f   : > { %v3616_v13 = vpop.eup %2475  ;;  %v1855_v44 = vmul.f32 %v2474_v22, %v1679_v28  ;;  %v1253_v49 = vpop.xlane.xlu1 %1252  ;;  %2481 = vrcp.f32 %v1586_v59 }
 0x270   : > { %v1393_v31 = vsub.f32 %v3286_v60, %v1253_v49  ;;  %2483 = vpow2.f32 %v1544_v6  ;;  %v1629_v47 = vsel %vm1175_vm1, %v3616_v13, 0.0  ;;  %v3901_v6 = vld [vmem:[#allocation6_spill] sm:$0xff] }
 0x271   : > { %v1919_v40 = vsub.f32 2.0, %v1855_v44  ;;  %v3621_v46 = vpop.eup %2477 }
 0x272   : > { %v1482_v14 = vmul.f32 1.442695, %v1393_v31  ;;  %1630 = vadd.xlane.f32.xlu0 %v1629_v47  ;;  %v1632_v17 = vsel %vm1175_vm1, %v3621_v46, 0.0  ;;  %v3903_v47 = vld [vmem:[#allocation10_spill] sm:$0xff] }
 0x273   : > { %v1983_v51 = vmul.f32 %v2474_v22, %v1919_v40  ;;  %1633 = vadd.xlane.f32.xlu1 %v1632_v17 }
 0x274   : > { %2485 = vpow2.f32 %v1482_v14  ;;  %v2480_v15 = vpop.eup %2479 }
 0x275   : > { %v2047_v60 = vmul.f32 %v3898_v54, %v1983_v51  ;;  %v2482_v10 = vpop.eup %2481  ;;  %v1856_v18 = vmul.f32 %v2480_v15, %v1682_v16  ;;  %v1256_v7 = vpop.xlane.xlu2 %1255  ;;  %v3902_v16 = vld [vmem:[#allocation5_spill] sm:$0xff] }
 0x276   : > { %v1349_v55 = vpop.xlane.xlu0 %1348  ;;  %v3628_v25 = vpop.eup %2483  ;;  %v1824_v28 = vmul.f32 %v2482_v10, %v1586_v59  ;;  %v1394_v2 = vsub.f32 %v3899_v30, %v1256_v7 }
 0x277   : > { %2111 = vst.msk [vmem:[%s3412_s26 + $0x138] sm:$0xff] %vm1175_vm1, %v2047_v60  ;;  %v1589_v1 = vpop.xlane.xlu1 %1588  ;;  %v1425_v53 = vsub.f32 %v3900_v24, %v1349_v55  ;;  %v1920_v58 = vsub.f32 2.0, %v1856_v18  ;;  %v1728_v3 = vsel %vm1175_vm1, %v3628_v25, 0.0 }
 0x278   : > { %2487 = vrcp.f32 %v1589_v1  ;;  %v1888_v27 = vsub.f32 2.0, %v1824_v28  ;;  %v1484_v48 = vmul.f32 1.442695, %v1394_v2  ;;  %v3904_v28 = vld [vmem:[#allocation9_spill] sm:$0xff] }
 0x279   : > { %v1546_v20 = vmul.f32 1.442695, %v1425_v53  ;;  %v1984_v43 = vmul.f32 %v2480_v15, %v1920_v58 }
 0x27a   : > { %v3634_v38 = vpop.eup %2485  ;;  %v1952_v41 = vmul.f32 %v2482_v10, %v1888_v27  ;;  %2489 = vpow2.f32 %v1484_v48  ;;  %1729 = vadd.xlane.f32.xlu0 %v1728_v3  ;;  %v3905_v27 = vld [vmem:[#allocation14_spill] sm:$0xff] }
 0x27b   : > { %v1635_v5 = vsel %vm1175_vm1, %v3634_v38, 0.0  ;;  %v2048_v22 = vmul.f32 %v3901_v6, %v1984_v43  ;;  %2491 = vpow2.f32 %v1546_v20  ;;  %v3906_v43 = vld [vmem:[#allocation13_spill] sm:$0xff] }
 0x27c   : > { %1636 = vadd.xlane.f32.xlu2 %v1635_v5  ;;  %v2016_v59 = vmul.f32 %v3902_v16, %v1952_v41 }
 0x27d   : > { %2112 = vst.msk [vmem:[%s3412_s26 + $0x140] sm:$0xff] %vm1175_vm1, %v2048_v22  ;;  %v1592_v49 = vpop.xlane.xlu2 %1591 }
 0x27e   : > { %v2488_v44 = vpop.eup %2487  ;;  %v1685_v31 = vpop.xlane.xlu0 %1684  ;;  %2080 = vst.msk [vmem:[%s3412_s26 + $0x40] sm:$0xff] %vm1175_vm1, %v2016_v59  ;;  %2493 = vrcp.f32 %v1592_v49 }
 0x27f   : > { %v1825_v40 = vmul.f32 %v2488_v44, %v1589_v1  ;;  %v1352_v14 = vpop.xlane.xlu1 %1351  ;;  %2495 = vrcp.f32 %v1685_v31 }
 0x280   : > { %v1426_v51 = vsub.f32 %v3903_v47, %v1352_v14  ;;  %v3647_v17 = vpop.eup %2489  ;;  %v3908_v14 = vld [vmem:[#allocation11_spill] sm:$0xff] }
 0x281   : > { %v1889_v15 = vsub.f32 2.0, %v1825_v40  ;;  %v3649_v54 = vpop.eup %2491  ;;  %v1638_v10 = vsel %vm1175_vm1, %v3647_v17, 0.0 }
 0x282   : > { %v1548_v60 = vmul.f32 1.442695, %v1426_v51  ;;  %1639 = vadd.xlane.f32.xlu0 %v1638_v10  ;;  %v1731_v7 = vsel %vm1175_vm1, %v3649_v54, 0.0 }
 0x283   : > { %v1953_v18 = vmul.f32 %v2488_v44, %v1889_v15  ;;  %1732 = vadd.xlane.f32.xlu1 %v1731_v7  ;;  %v3909_v7 = vld [vmem:[#allocation16_spill] sm:$0xff] }
 0x284   : > { %2497 = vpow2.f32 %v1548_v60  ;;  %v2494_v55 = vpop.eup %2493 }
 0x285   : > { %v2017_v30 = vmul.f32 %v3904_v28, %v1953_v18  ;;  %v2496_v2 = vpop.eup %2495  ;;  %v1826_v1 = vmul.f32 %v2494_v55, %v1592_v49  ;;  %v1355_v24 = vpop.xlane.xlu2 %1354 }
 0x286   : > { %v1259_v53 = vpop.xlane.xlu0 %1258  ;;  %v1857_v58 = vmul.f32 %v2496_v2, %v1685_v31  ;;  %v1427_v48 = vsub.f32 %v3905_v27, %v1355_v24  ;;  %v3907_v31 = vld [vmem:[#allocation12_spill] sm:$0xff] }
 0x287   : > { %2081 = vst.msk [vmem:[%s3412_s26 + $0x48] sm:$0xff] %vm1175_vm1, %v2017_v30  ;;  %v1688_v20 = vpop.xlane.xlu1 %1687  ;;  %v1395_v3 = vsub.f32 %v3906_v43, %v1259_v53  ;;  %v1890_v41 = vsub.f32 2.0, %v1826_v1 }
 0x288   : > { %2499 = vrcp.f32 %v1688_v20  ;;  %v1921_v5 = vsub.f32 2.0, %v1857_v58  ;;  %v1550_v6 = vmul.f32 1.442695, %v1427_v48  ;;  %v3910_v48 = vld [vmem:[#allocation15_spill] sm:$0xff] }
 0x289   : > { %v1486_v22 = vmul.f32 1.442695, %v1395_v3  ;;  %v1954_v59 = vmul.f32 %v2494_v55, %v1890_v41 }
 0x28a   : > { %v3660_v16 = vpop.eup %2497  ;;  %v1985_v44 = vmul.f32 %v2496_v2, %v1921_v5  ;;  %2501 = vpow2.f32 %v1550_v6 }
 0x28b   : > { %v1734_v49 = vsel %vm1175_vm1, %v3660_v16, 0.0  ;;  %v2018_v40 = vmul.f32 %v3907_v31, %v1954_v59  ;;  %2503 = vpow2.f32 %v1486_v22  ;;  %v3911_v22 = vld [vmem:[#allocation19_spill] sm:$0xff] }
 0x28c   : > { %1735 = vadd.xlane.f32.xlu2 %v1734_v49  ;;  %v2049_v47 = vmul.f32 %v3908_v14, %v1985_v44  ;;  %v3912_v49 = vld [vmem:[#allocation20_spill] sm:$0xff] }
 0x28d   : > { %2082 = vst.msk [vmem:[%s3412_s26 + $0x50] sm:$0xff] %vm1175_vm1, %v2018_v40  ;;  %v1691_v15 = vpop.xlane.xlu2 %1690 }
 0x28e   : > { %v2500_v51 = vpop.eup %2499  ;;  %v1595_v60 = vpop.xlane.xlu0 %1594  ;;  %2113 = vst.msk [vmem:[%s3412_s26 + $0x148] sm:$0xff] %vm1175_vm1, %v2049_v47  ;;  %2505 = vrcp.f32 %v1691_v15 }
 0x28f   : > { %v1858_v10 = vmul.f32 %v2500_v51, %v1688_v20  ;;  %v1262_v18 = vpop.xlane.xlu1 %1261  ;;  %2507 = vrcp.f32 %v1595_v60 }
 0x290   : > { %v1396_v55 = vsub.f32 %v3909_v7, %v1262_v18  ;;  %v3671_v28 = vpop.eup %2501  ;;  %v3913_v7 = vld [vmem:[#allocation18_spill] sm:$0xff] }
 0x291   : > { %v1922_v30 = vsub.f32 2.0, %v1858_v10  ;;  %v3673_v2 = vpop.eup %2503  ;;  %v1737_v24 = vsel %vm1175_vm1, %v3671_v28, 0.0 }
 0x292   : > { %v1488_v1 = vmul.f32 1.442695, %v1396_v55  ;;  %1738 = vadd.xlane.f32.xlu0 %v1737_v24  ;;  %v1641_v58 = vsel %vm1175_vm1, %v3673_v2, 0.0 }
 0x293   : > { %v1986_v53 = vmul.f32 %v2500_v51, %v1922_v30  ;;  %1642 = vadd.xlane.f32.xlu1 %v1641_v58  ;;  %v3914_v30 = vld [vmem:[#allocation17_spill] sm:$0xff] }
 0x294   : > { %2509 = vpow2.f32 %v1488_v1  ;;  %v2506_v27 = vpop.eup %2505 }
 0x295   : > { %v2050_v20 = vmul.f32 %v3910_v48, %v1986_v53  ;;  %v2508_v43 = vpop.eup %2507  ;;  %v1859_v3 = vmul.f32 %v2506_v27, %v1691_v15  ;;  %v1265_v41 = vpop.xlane.xlu2 %1264 }
 0x296   : > { %v1358_v5 = vpop.xlane.xlu0 %1357  ;;  %v1827_v6 = vmul.f32 %v2508_v43, %v1595_v60  ;;  %v1397_v59 = vsub.f32 %v3911_v22, %v1265_v41 }
 0x297   : > { %2114 = vst.msk [vmem:[%s3412_s26 + $0x150] sm:$0xff] %vm1175_vm1, %v2050_v20  ;;  %v1598_v44 = vpop.xlane.xlu1 %1597  ;;  %v1428_v31 = vsub.f32 %v3912_v49, %v1358_v5  ;;  %v1923_v40 = vsub.f32 2.0, %v1859_v3 }
 0x298   : > { %2511 = vrcp.f32 %v1598_v44  ;;  %v1891_v14 = vsub.f32 2.0, %v1827_v6  ;;  %v1490_v47 = vmul.f32 1.442695, %v1397_v59  ;;  %v3915_v59 = vld [vmem:[#allocation21_spill] sm:$0xff] }
 0x299   : > { %v1552_v51 = vmul.f32 1.442695, %v1428_v31  ;;  %v1987_v15 = vmul.f32 %v2506_v27, %v1923_v40 }
 0x29a   : > { %v3684_v10 = vpop.eup %2509  ;;  %v1955_v18 = vmul.f32 %v2508_v43, %v1891_v14  ;;  %2513 = vpow2.f32 %v1490_v47 }
 0x29b   : > { %v1644_v60 = vsel %vm1175_vm1, %v3684_v10, 0.0  ;;  %v2051_v55 = vmul.f32 %v3913_v7, %v1987_v15  ;;  %2515 = vpow2.f32 %v1552_v51 }
 0x29c   : > { %1645 = vadd.xlane.f32.xlu2 %v1644_v60  ;;  %v2019_v1 = vmul.f32 %v3914_v30, %v1955_v18 }
 0x29d   : > { %2115 = vst.msk [vmem:[%s3412_s26 + $0x158] sm:$0xff] %vm1175_vm1, %v2051_v55  ;;  %v1601_v53 = vpop.xlane.xlu2 %1600 }
 0x29e   : > { %v2512_v24 = vpop.eup %2511  ;;  %v1694_v58 = vpop.xlane.xlu0 %1693  ;;  %2083 = vst.msk [vmem:[%s3412_s26 + $0x58] sm:$0xff] %vm1175_vm1, %v2019_v1  ;;  %2517 = vrcp.f32 %v1601_v53 }
 0x29f   : > { %v1828_v48 = vmul.f32 %v2512_v24, %v1598_v44  ;;  %v1361_v27 = vpop.xlane.xlu1 %1360  ;;  %2519 = vrcp.f32 %v1694_v58 }
 0x2a0   : > { %v3694_v20 = vpop.eup %2513 }
 0x2a1   : > { %v1892_v43 = vsub.f32 2.0, %v1828_v48  ;;  %v3696_v3 = vpop.eup %2515  ;;  %v1647_v41 = vsel %vm1175_vm1, %v3694_v20, 0.0 }
 0x2a2   : > { %1648 = vadd.xlane.f32.xlu0 %v1647_v41  ;;  %v1740_v6 = vsel %vm1175_vm1, %v3696_v3, 0.0 }
 0x2a3   : > { %v1956_v5 = vmul.f32 %v2512_v24, %v1892_v43  ;;  %1741 = vadd.xlane.f32.xlu1 %v1740_v6 }
 0x2a4   : > { %v2518_v22 = vpop.eup %2517 }
 0x2a5   : > { %v2020_v44 = vmul.f32 %v3915_v59, %v1956_v5  ;;  %v2520_v49 = vpop.eup %2519  ;;  %v1829_v31 = vmul.f32 %v2518_v22, %v1601_v53  ;;  %v1364_v40 = vpop.xlane.xlu2 %1363 }
 0x2a6   : > { %v1268_v14 = vpop.xlane.xlu0 %1267  ;;  %v1860_v47 = vmul.f32 %v2520_v49, %v1694_v58  ;;  %v1430_v51 = vsub.f32 %v3441_v0, %v1364_v40 }
 0x2a7   : > { %2084 = vst.msk [vmem:[%s3412_s26 + $0x60] sm:$0xff] %vm1175_vm1, %v2020_v44  ;;  %v1697_v15 = vpop.xlane.xlu1 %1696  ;;  %v1398_v18 = vsub.f32 %v3438_v62, %v1268_v14  ;;  %v1893_v60 = vsub.f32 2.0, %v1829_v31 }
 0x2a8   : > { %2521 = vrcp.f32 %v1697_v15  ;;  %v1924_v7 = vsub.f32 2.0, %v1860_v47  ;;  %v1556_v55 = vmul.f32 1.442695, %v1430_v51 }
 0x2a9   : > { %v1492_v30 = vmul.f32 1.442695, %v1398_v18  ;;  %v1957_v1 = vmul.f32 %v2518_v22, %v1893_v60 }
 0x2aa   : > { %v1988_v24 = vmul.f32 %v2520_v49, %v1924_v7  ;;  %2523 = vpow2.f32 %v1556_v55 }
 0x2ab   : > { %v2021_v53 = vmul.f32 %v3424_v37, %v1957_v1  ;;  %2525 = vpow2.f32 %v1492_v30 }
 0x2ac   : > { %v2052_v58 = vmul.f32 %v3405_v42, %v1988_v24  ;;  %v1429_v42 = vsub.f32 %v3418_v33, %v1361_v27 }
 0x2ad   : > { %2085 = vst.msk [vmem:[%s3412_s26 + $0x68] sm:$0xff] %vm1175_vm1, %v2021_v53  ;;  %v1700_v0 = vpop.xlane.xlu2 %1699 }
 0x2ae   : > { %v2522_v48 = vpop.eup %2521  ;;  %v1604_v43 = vpop.xlane.xlu0 %1603  ;;  %2116 = vst.msk [vmem:[%s3412_s26 + $0x160] sm:$0xff] %vm1175_vm1, %v2052_v58  ;;  %2527 = vrcp.f32 %v1700_v0  ;;  %v1554_v47 = vmul.f32 1.442695, %v1429_v42 }
 0x2af   : > { %v1861_v62 = vmul.f32 %v2522_v48, %v1697_v15  ;;  %v1271_v41 = vpop.xlane.xlu1 %1270  ;;  %2529 = vrcp.f32 %v1604_v43 }
 0x2b0   : > { %v1399_v5 = vsub.f32 %v3466_v52, %v1271_v41  ;;  %v3714_v6 = vpop.eup %2523 }
 0x2b1   : > { %v1925_v22 = vsub.f32 2.0, %v1861_v62  ;;  %v3716_v37 = vpop.eup %2525  ;;  %v1746_v44 = vsel %vm1175_vm1, %v3714_v6, 0.0 }
 0x2b2   : > { %v1494_v59 = vmul.f32 1.442695, %v1399_v5  ;;  %1747 = vadd.xlane.f32.xlu0 %v1746_v44  ;;  %v1650_v31 = vsel %vm1175_vm1, %v3716_v37, 0.0 }
 0x2b3   : > { %v1989_v49 = vmul.f32 %v2522_v48, %v1925_v22  ;;  %1651 = vadd.xlane.f32.xlu1 %v1650_v31 }
 0x2b4   : > { %2531 = vpow2.f32 %v1494_v59  ;;  %v2528_v52 = vpop.eup %2527 }
 0x2b5   : > { %v2053_v40 = vmul.f32 %v3452_v35, %v1989_v49  ;;  %v2530_v14 = vpop.eup %2529  ;;  %v1862_v51 = vmul.f32 %v2528_v52, %v1700_v0  ;;  %v1610_v15 = vpop.xlane.xlu2 %1609 }
 0x2b6   : > { %v1367_v18 = vpop.xlane.xlu0 %1366  ;;  %v1830_v33 = vmul.f32 %v2530_v14, %v1604_v43  ;;  %2533 = vrcp.f32 %v1610_v15 }
 0x2b7   : > { %2117 = vst.msk [vmem:[%s3412_s26 + $0x168] sm:$0xff] %vm1175_vm1, %v2053_v40  ;;  %v1607_v27 = vpop.xlane.xlu1 %1606  ;;  %v1431_v60 = vsub.f32 %v3490_v12, %v1367_v18  ;;  %v1926_v7 = vsub.f32 2.0, %v1862_v51 }
 0x2b8   : > { %2535 = vrcp.f32 %v1607_v27  ;;  %v1894_v55 = vsub.f32 2.0, %v1830_v33 }
 0x2b9   : > { %v1558_v30 = vmul.f32 1.442695, %v1431_v60  ;;  %2537 = vpow2.f32 %v1554_v47  ;;  %v1990_v35 = vmul.f32 %v2528_v52, %v1926_v7 }
 0x2ba   : > { %v3727_v1 = vpop.eup %2531  ;;  %v1958_v24 = vmul.f32 %v2530_v14, %v1894_v55 }
 0x2bb   : > { %2539 = vpow2.f32 %v1558_v30  ;;  %v1653_v53 = vsel %vm1175_vm1, %v3727_v1, 0.0  ;;  %v2054_v58 = vmul.f32 %v3474_v23, %v1990_v35 }
 0x2bc   : > { %1654 = vadd.xlane.f32.xlu2 %v1653_v53  ;;  %v2534_v48 = vpop.eup %2533  ;;  %v2022_v12 = vmul.f32 %v3462_v4, %v1958_v24 }
 0x2bd   : > { %2118 = vst.msk [vmem:[%s3412_s26 + $0x170] sm:$0xff] %vm1175_vm1, %v2054_v58  ;;  %v1832_v43 = vmul.f32 %v2534_v48, %v1610_v15  ;;  %v1709_v62 = vpop.xlane.xlu2 %1708 }
 0x2be   : > { %v2536_v0 = vpop.eup %2535  ;;  %v1703_v41 = vpop.xlane.xlu0 %1702  ;;  %2086 = vst.msk [vmem:[%s3412_s26 + $0x70] sm:$0xff] %vm1175_vm1, %v2022_v12  ;;  %2541 = vrcp.f32 %v1709_v62 }
 0x2bf   : > { %v1831_v5 = vmul.f32 %v2536_v0, %v1607_v27  ;;  %v1706_v22 = vpop.xlane.xlu1 %1705  ;;  %v3737_v42 = vpop.eup %2537  ;;  %v1896_v59 = vsub.f32 2.0, %v1832_v43 }
 0x2c0   : > { %2543 = vrcp.f32 %v1706_v22  ;;  %v1743_v52 = vsel %vm1175_vm1, %v3737_v42, 0.0 }
 0x2c1   : > { %v3739_v23 = vpop.eup %2539  ;;  %v1895_v44 = vsub.f32 2.0, %v1831_v5  ;;  %2545 = vrcp.f32 %v1703_v41  ;;  %v1960_v4 = vmul.f32 %v2534_v48, %v1896_v59 }
 0x2c2   : > { %v1749_v49 = vsel %vm1175_vm1, %v3739_v23, 0.0 }
 0x2c3   : > { %v1959_v31 = vmul.f32 %v2536_v0, %v1895_v44  ;;  %1750 = vadd.xlane.f32.xlu1 %v1749_v49  ;;  %v2024_v40 = vmul.f32 %v3497_v9, %v1960_v4 }
 0x2c4   : > { %1744 = vadd.xlane.f32.xlu2 %v1743_v52  ;;  %v2542_v14 = vpop.eup %2541 }
 0x2c5   : > { %v2023_v47 = vmul.f32 %v3492_v34, %v1959_v31  ;;  %2088 = vst.msk [vmem:[%s3412_s26 + $0x80] sm:$0xff] %vm1175_vm1, %v2024_v40  ;;  %v1865_v15 = vmul.f32 %v2542_v14, %v1709_v62  ;;  %v1619_v18 = vpop.xlane.xlu2 %1618 }
 0x2c6   : > { %v2544_v51 = vpop.eup %2543  ;;  %v1613_v33 = vpop.xlane.xlu0 %1612  ;;  %2547 = vrcp.f32 %v1619_v18 }
 0x2c7   : > { %v2546_v27 = vpop.eup %2545  ;;  %2087 = vst.msk [vmem:[%s3412_s26 + $0x78] sm:$0xff] %vm1175_vm1, %v2023_v47  ;;  %v1864_v60 = vmul.f32 %v2544_v51, %v1706_v22  ;;  %v1616_v7 = vpop.xlane.xlu1 %1615  ;;  %v1929_v55 = vsub.f32 2.0, %v1865_v15 }
 0x2c8   : > { %v1863_v30 = vmul.f32 %v2546_v27, %v1703_v41  ;;  %2549 = vrcp.f32 %v1616_v7 }
 0x2c9   : > { %v1928_v9 = vsub.f32 2.0, %v1864_v60  ;;  %2551 = vrcp.f32 %v1613_v33  ;;  %v1993_v34 = vmul.f32 %v2542_v14, %v1929_v55 }
 0x2ca   : > { %v1927_v35 = vsub.f32 2.0, %v1863_v30 }
 0x2cb   : > { %v1992_v24 = vmul.f32 %v2544_v51, %v1928_v9  ;;  %v2057_v53 = vmul.f32 %v3520_v57, %v1993_v34 }
 0x2cc   : > { %v1991_v58 = vmul.f32 %v2546_v27, %v1927_v35  ;;  %v2548_v48 = vpop.eup %2547 }
 0x2cd   : > { %v2056_v12 = vmul.f32 %v3524_v39, %v1992_v24  ;;  %2121 = vst.msk [vmem:[%s3412_s26 + $0x188] sm:$0xff] %vm1175_vm1, %v2057_v53  ;;  %v1835_v62 = vmul.f32 %v2548_v48, %v1619_v18  ;;  %v1718_v41 = vpop.xlane.xlu2 %1717 }
 0x2ce   : > { %v2550_v0 = vpop.eup %2549  ;;  %v2055_v43 = vmul.f32 %v3513_v21, %v1991_v58  ;;  %v1712_v5 = vpop.xlane.xlu0 %1711  ;;  %2553 = vrcp.f32 %v1718_v41 }
 0x2cf   : > { %v2552_v22 = vpop.eup %2551  ;;  %2120 = vst.msk [vmem:[%s3412_s26 + $0x180] sm:$0xff] %vm1175_vm1, %v2056_v12  ;;  %v1834_v59 = vmul.f32 %v2550_v0, %v1616_v7  ;;  %v1715_v44 = vpop.xlane.xlu1 %1714  ;;  %v1899_v57 = vsub.f32 2.0, %v1835_v62 }
 0x2d0   : > { %2119 = vst.msk [vmem:[%s3412_s26 + $0x178] sm:$0xff] %vm1175_vm1, %v2055_v43  ;;  %v1833_v4 = vmul.f32 %v2552_v22, %v1613_v33  ;;  %2555 = vrcp.f32 %v1715_v44 }
 0x2d1   : > { %v1898_v39 = vsub.f32 2.0, %v1834_v59  ;;  %2557 = vrcp.f32 %v1712_v5  ;;  %v1963_v49 = vmul.f32 %v2548_v48, %v1899_v57 }
 0x2d2   : > { %v1897_v21 = vsub.f32 2.0, %v1833_v4 }
 0x2d3   : > { %v1962_v31 = vmul.f32 %v2550_v0, %v1898_v39  ;;  %v2027_v52 = vmul.f32 %v3541_v45, %v1963_v49 }
 0x2d4   : > { %v1961_v40 = vmul.f32 %v2552_v22, %v1897_v21  ;;  %v2554_v14 = vpop.eup %2553 }
 0x2d5   : > { %v2026_v47 = vmul.f32 %v3547_v63, %v1962_v31  ;;  %2091 = vst.msk [vmem:[%s3412_s26 + $0x98] sm:$0xff] %vm1175_vm1, %v2027_v52  ;;  %v1868_v18 = vmul.f32 %v2554_v14, %v1718_v41  ;;  %v1628_v33 = vpop.xlane.xlu2 %1627 }
 0x2d6   : > { %v2556_v51 = vpop.eup %2555  ;;  %v2025_v15 = vmul.f32 %v3536_v50, %v1961_v40  ;;  %v1622_v27 = vpop.xlane.xlu0 %1621  ;;  %2559 = vrcp.f32 %v1628_v33 }
 0x2d7   : > { %v2558_v60 = vpop.eup %2557  ;;  %2090 = vst.msk [vmem:[%s3412_s26 + $0x90] sm:$0xff] %vm1175_vm1, %v2026_v47  ;;  %v1867_v7 = vmul.f32 %v2556_v51, %v1715_v44  ;;  %v1625_v55 = vpop.xlane.xlu1 %1624  ;;  %v1932_v45 = vsub.f32 2.0, %v1868_v18 }
 0x2d8   : > { %2089 = vst.msk [vmem:[%s3412_s26 + $0x88] sm:$0xff] %vm1175_vm1, %v2025_v15  ;;  %v1866_v30 = vmul.f32 %v2558_v60, %v1712_v5  ;;  %2561 = vrcp.f32 %v1625_v55 }
 0x2d9   : > { %v1931_v63 = vsub.f32 2.0, %v1867_v7  ;;  %2563 = vrcp.f32 %v1622_v27  ;;  %v1996_v9 = vmul.f32 %v2554_v14, %v1932_v45 }
 0x2da   : > { %v1930_v50 = vsub.f32 2.0, %v1866_v30 }
 0x2db   : > { %v1995_v34 = vmul.f32 %v2556_v51, %v1931_v63  ;;  %v2060_v35 = vmul.f32 %v3560_v32, %v1996_v9 }
 0x2dc   : > { %v1994_v24 = vmul.f32 %v2558_v60, %v1930_v50  ;;  %v2560_v53 = vpop.eup %2559 }
 0x2dd   : > { %v2059_v58 = vmul.f32 %v3564_v8, %v1995_v34  ;;  %2124 = vst.msk [vmem:[%s3412_s26 + $0x1a0] sm:$0xff] %vm1175_vm1, %v2060_v35  ;;  %v1838_v0 = vmul.f32 %v2560_v53, %v1628_v33 }
 0x2de   : > { %v2562_v48 = vpop.eup %2561  ;;  %v2058_v12 = vmul.f32 %v3557_v11, %v1994_v24  ;;  %v1721_v43 = vpop.xlane.xlu0 %1720 }
 0x2df   : > { %v2564_v62 = vpop.eup %2563  ;;  %2123 = vst.msk [vmem:[%s3412_s26 + $0x198] sm:$0xff] %vm1175_vm1, %v2059_v58  ;;  %v1837_v41 = vmul.f32 %v2562_v48, %v1625_v55  ;;  %v1727_v5 = vpop.xlane.xlu2 %1726  ;;  %2565 = vrcp.f32 %v1721_v43  ;;  %v1902_v32 = vsub.f32 2.0, %v1838_v0 }
 0x2e0   : > { %v1724_v22 = vpop.xlane.xlu1 %1723  ;;  %2122 = vst.msk [vmem:[%s3412_s26 + $0x190] sm:$0xff] %vm1175_vm1, %v2058_v12  ;;  %v1836_v59 = vmul.f32 %v2564_v62, %v1622_v27  ;;  %2567 = vrcp.f32 %v1727_v5 }
 0x2e1   : > { %v1901_v8 = vsub.f32 2.0, %v1837_v41  ;;  %2569 = vrcp.f32 %v1724_v22  ;;  %v1966_v44 = vmul.f32 %v2560_v53, %v1902_v32 }
 0x2e2   : > { %v1900_v11 = vsub.f32 2.0, %v1836_v59 }
 0x2e3   : > { %v1965_v57 = vmul.f32 %v2562_v48, %v1901_v8  ;;  %v2030_v4 = vmul.f32 %v3581_v61, %v1966_v44 }
 0x2e4   : > { %v1964_v39 = vmul.f32 %v2564_v62, %v1900_v11 }
 0x2e5   : > { %v2566_v49 = vpop.eup %2565  ;;  %v2029_v21 = vmul.f32 %v3585_v56, %v1965_v57  ;;  %2094 = vst.msk [vmem:[%s3412_s26 + $0xb0] sm:$0xff] %vm1175_vm1, %v2030_v4 }
 0x2e6   : > { %v2568_v31 = vpop.eup %2567  ;;  %v2028_v52 = vmul.f32 %v3576_v19, %v1964_v39  ;;  %v1869_v40 = vmul.f32 %v2566_v49, %v1721_v43  ;;  %v1631_v14 = vpop.xlane.xlu0 %1630 }
 0x2e7   : > { %v2570_v47 = vpop.eup %2569  ;;  %2093 = vst.msk [vmem:[%s3412_s26 + $0xa8] sm:$0xff] %vm1175_vm1, %v2029_v21  ;;  %v1871_v51 = vmul.f32 %v2568_v31, %v1727_v5  ;;  %2571 = vrcp.f32 %v1631_v14 }
 0x2e8   : > { %v1634_v15 = vpop.xlane.xlu1 %1633  ;;  %2092 = vst.msk [vmem:[%s3412_s26 + $0xa0] sm:$0xff] %vm1175_vm1, %v2028_v52  ;;  %v1870_v61 = vmul.f32 %v2570_v47, %v1724_v22  ;;  %v1933_v18 = vsub.f32 2.0, %v1869_v40 }
 0x2e9   : > { %2573 = vrcp.f32 %v1634_v15  ;;  %v1935_v56 = vsub.f32 2.0, %v1871_v51 }
 0x2ea   : > { %v1934_v33 = vsub.f32 2.0, %v1870_v61  ;;  %v1997_v27 = vmul.f32 %v2566_v49, %v1933_v18 }
 0x2eb   : > { %v1999_v19 = vmul.f32 %v2568_v31, %v1935_v56 }
 0x2ec   : > { %v1998_v60 = vmul.f32 %v2570_v47, %v1934_v33  ;;  %v2061_v7 = vmul.f32 %v3596_v36, %v1997_v27 }
 0x2ed   : > { %v2572_v55 = vpop.eup %2571  ;;  %v2063_v45 = vmul.f32 %v3604_v26, %v1999_v19 }
 0x2ee   : > { %v2062_v63 = vmul.f32 %v3601_v29, %v1998_v60  ;;  %2125 = vst.msk [vmem:[%s3412_s26 + $0x1a8] sm:$0xff] %vm1175_vm1, %v2061_v7  ;;  %v1839_v9 = vmul.f32 %v2572_v55, %v1631_v14  ;;  %v1730_v50 = vpop.xlane.xlu0 %1729 }
 0x2ef   : > { %v2574_v30 = vpop.eup %2573  ;;  %2127 = vst.msk [vmem:[%s3412_s26 + $0x1b8] sm:$0xff] %vm1175_vm1, %v2063_v45  ;;  %v1637_v35 = vpop.xlane.xlu2 %1636  ;;  %2575 = vrcp.f32 %v1730_v50 }
 0x2f0   : > { %v1840_v34 = vmul.f32 %v2574_v30, %v1634_v15  ;;  %2126 = vst.msk [vmem:[%s3412_s26 + $0x1b0] sm:$0xff] %vm1175_vm1, %v2062_v63  ;;  %v1903_v36 = vsub.f32 2.0, %v1839_v9  ;;  %2577 = vrcp.f32 %v1637_v35 }
 0x2f2   : > { %v1904_v24 = vsub.f32 2.0, %v1840_v34  ;;  %v1967_v26 = vmul.f32 %v2572_v55, %v1903_v36 }
 0x2f4   : > { %v1968_v53 = vmul.f32 %v2574_v30, %v1904_v24  ;;  %v2031_v29 = vmul.f32 %v3616_v13, %v1967_v26 }
 0x2f5   : > { %v2576_v58 = vpop.eup %2575 }
 0x2f6   : > { %v2032_v48 = vmul.f32 %v3621_v46, %v1968_v53  ;;  %v2578_v12 = vpop.eup %2577  ;;  %2095 = vst.msk [vmem:[%s3412_s26 + $0xb8] sm:$0xff] %vm1175_vm1, %v2031_v29  ;;  %v1872_v0 = vmul.f32 %v2576_v58, %v1730_v50  ;;  %v1640_v43 = vpop.xlane.xlu0 %1639 }
 0x2f7   : > { %v1841_v62 = vmul.f32 %v2578_v12, %v1637_v35  ;;  %v1733_v41 = vpop.xlane.xlu1 %1732  ;;  %2579 = vrcp.f32 %v1640_v43 }
 0x2f8   : > { %2096 = vst.msk [vmem:[%s3412_s26 + $0xc0] sm:$0xff] %vm1175_vm1, %v2032_v48  ;;  %v1936_v5 = vsub.f32 2.0, %v1872_v0  ;;  %2581 = vrcp.f32 %v1733_v41 }
 0x2f9   : > { %v1905_v22 = vsub.f32 2.0, %v1841_v62 }
 0x2fa   : > { %v2000_v32 = vmul.f32 %v2576_v58, %v1936_v5 }
 0x2fb   : > { %v1969_v13 = vmul.f32 %v2578_v12, %v1905_v22 }
 0x2fc   : > { %v2064_v59 = vmul.f32 %v3628_v25, %v2000_v32 }
 0x2fd   : > { %v2580_v46 = vpop.eup %2579  ;;  %v2033_v8 = vmul.f32 %v3634_v38, %v1969_v13 }
 0x2fe   : > { %v2582_v44 = vpop.eup %2581  ;;  %2128 = vst.msk [vmem:[%s3412_s26 + $0x1c0] sm:$0xff] %vm1175_vm1, %v2064_v59  ;;  %v1842_v11 = vmul.f32 %v2580_v46, %v1640_v43 }
 0x2ff   : > { %2097 = vst.msk [vmem:[%s3412_s26 + $0xc8] sm:$0xff] %vm1175_vm1, %v2033_v8  ;;  %v1873_v57 = vmul.f32 %v2582_v44, %v1733_v41  ;;  %v1736_v4 = vpop.xlane.xlu2 %1735 }
 0x300   : > { %v1906_v39 = vsub.f32 2.0, %v1842_v11  ;;  %2583 = vrcp.f32 %v1736_v4 }
 0x301   : > { %v1937_v49 = vsub.f32 2.0, %v1873_v57 }
 0x302   : > { %v1970_v21 = vmul.f32 %v2580_v46, %v1906_v39 }
 0x303   : > { %v2001_v31 = vmul.f32 %v2582_v44, %v1937_v49 }
 0x304   : > { %v2034_v25 = vmul.f32 %v3647_v17, %v1970_v21 }
 0x305   : > { %v2065_v52 = vmul.f32 %v3649_v54, %v2001_v31  ;;  %v1739_v40 = vpop.xlane.xlu0 %1738 }
 0x306   : > { %v2584_v38 = vpop.eup %2583  ;;  %2098 = vst.msk [vmem:[%s3412_s26 + $0xd0] sm:$0xff] %vm1175_vm1, %v2034_v25  ;;  %v1643_v47 = vpop.xlane.xlu1 %1642  ;;  %2585 = vrcp.f32 %v1739_v40 }
 0x307   : > { %2129 = vst.msk [vmem:[%s3412_s26 + $0x1c8] sm:$0xff] %vm1175_vm1, %v2065_v52  ;;  %v1874_v14 = vmul.f32 %v2584_v38, %v1736_v4  ;;  %2587 = vrcp.f32 %v1643_v47 }
 0x309   : > { %v1938_v51 = vsub.f32 2.0, %v1874_v14 }
 0x30b   : > { %v2002_v15 = vmul.f32 %v2584_v38, %v1938_v51 }
 0x30c   : > { %v2586_v61 = vpop.eup %2585 }
 0x30d   : > { %v2066_v18 = vmul.f32 %v3660_v16, %v2002_v15  ;;  %v2588_v17 = vpop.eup %2587  ;;  %v1875_v56 = vmul.f32 %v2586_v61, %v1739_v40 }
 0x30e   : > { %v1843_v54 = vmul.f32 %v2588_v17, %v1643_v47 }
 0x30f   : > { %2130 = vst.msk [vmem:[%s3412_s26 + $0x1d0] sm:$0xff] %vm1175_vm1, %v2066_v18  ;;  %v1646_v33 = vpop.xlane.xlu2 %1645  ;;  %v1939_v27 = vsub.f32 2.0, %v1875_v56 }
 0x310   : > { %2589 = vrcp.f32 %v1646_v33  ;;  %v1907_v19 = vsub.f32 2.0, %v1843_v54 }
 0x311   : > { %v2003_v60 = vmul.f32 %v2586_v61, %v1939_v27 }
 0x312   : > { %v1971_v7 = vmul.f32 %v2588_v17, %v1907_v19 }
 0x313   : > { %v2067_v55 = vmul.f32 %v3671_v28, %v2003_v60 }
 0x314   : > { %v2035_v45 = vmul.f32 %v3673_v2, %v1971_v7 }
 0x315   : > { %2131 = vst.msk [vmem:[%s3412_s26 + $0x1d8] sm:$0xff] %vm1175_vm1, %v2067_v55  ;;  %v1649_v16 = vpop.xlane.xlu0 %1648 }
 0x316   : > { %v2590_v30 = vpop.eup %2589  ;;  %2099 = vst.msk [vmem:[%s3412_s26 + $0xd8] sm:$0xff] %vm1175_vm1, %v2035_v45  ;;  %v1742_v9 = vpop.xlane.xlu1 %1741  ;;  %2591 = vrcp.f32 %v1649_v16 }
 0x317   : > { %v1844_v63 = vmul.f32 %v2590_v30, %v1646_v33  ;;  %2593 = vrcp.f32 %v1742_v9 }
 0x319   : > { %v1908_v50 = vsub.f32 2.0, %v1844_v63 }
 0x31b   : > { %v1972_v34 = vmul.f32 %v2590_v30, %v1908_v50 }
 0x31c   : > { %v2592_v35 = vpop.eup %2591 }
 0x31d   : > { %v2036_v28 = vmul.f32 %v3684_v10, %v1972_v34  ;;  %v2594_v36 = vpop.eup %2593  ;;  %v1845_v24 = vmul.f32 %v2592_v35, %v1649_v16 }
 0x31e   : > { %v1876_v2 = vmul.f32 %v2594_v36, %v1742_v9 }
 0x31f   : > { %2100 = vst.msk [vmem:[%s3412_s26 + $0xe0] sm:$0xff] %vm1175_vm1, %v2036_v28  ;;  %v1909_v26 = vsub.f32 2.0, %v1845_v24 }
 0x320   : > { %v1940_v53 = vsub.f32 2.0, %v1876_v2 }
 0x321   : > { %v1973_v29 = vmul.f32 %v2592_v35, %v1909_v26 }
 0x322   : > { %v2004_v58 = vmul.f32 %v2594_v36, %v1940_v53 }
 0x323   : > { %v2037_v48 = vmul.f32 %v3694_v20, %v1973_v29 }
 0x324   : > { %v2068_v12 = vmul.f32 %v3696_v3, %v2004_v58 }
 0x325   : > { %2101 = vst.msk [vmem:[%s3412_s26 + $0xe8] sm:$0xff] %vm1175_vm1, %v2037_v48  ;;  %v1748_v0 = vpop.xlane.xlu0 %1747 }
 0x326   : > { %2132 = vst.msk [vmem:[%s3412_s26 + $0x1e0] sm:$0xff] %vm1175_vm1, %v2068_v12  ;;  %v1652_v43 = vpop.xlane.xlu1 %1651  ;;  %2595 = vrcp.f32 %v1748_v0 }
 0x327   : > { %2597 = vrcp.f32 %v1652_v43 }
 0x32c   : > { %v2596_v10 = vpop.eup %2595 }
 0x32d   : > { %v2598_v62 = vpop.eup %2597  ;;  %v1878_v41 = vmul.f32 %v2596_v10, %v1748_v0 }
 0x32e   : > { %v1846_v5 = vmul.f32 %v2598_v62, %v1652_v43 }
 0x32f   : > { %v1655_v22 = vpop.xlane.xlu2 %1654  ;;  %v1942_v32 = vsub.f32 2.0, %v1878_v41 }
 0x330   : > { %2599 = vrcp.f32 %v1655_v22  ;;  %v1910_v20 = vsub.f32 2.0, %v1846_v5 }
 0x331   : > { %v2006_v13 = vmul.f32 %v2596_v10, %v1942_v32 }
 0x332   : > { %v1974_v3 = vmul.f32 %v2598_v62, %v1910_v20 }
 0x333   : > { %v2070_v59 = vmul.f32 %v3714_v6, %v2006_v13 }
 0x334   : > { %v2038_v46 = vmul.f32 %v3716_v37, %v1974_v3 }
 0x335   : > { %2134 = vst.msk [vmem:[%s3412_s26 + $0x1f0] sm:$0xff] %vm1175_vm1, %v2070_v59 }
 0x336   : > { %v2600_v8 = vpop.eup %2599  ;;  %v1751_v44 = vpop.xlane.xlu1 %1750  ;;  %2102 = vst.msk [vmem:[%s3412_s26 + $0xf0] sm:$0xff] %vm1175_vm1, %v2038_v46 }
 0x337   : > { %v1847_v11 = vmul.f32 %v2600_v8, %v1655_v22  ;;  %v1745_v57 = vpop.xlane.xlu2 %1744  ;;  %2601 = vrcp.f32 %v1751_v44 }
 0x338   : > { %2603 = vrcp.f32 %v1745_v57 }
 0x339   : > { %v1911_v4 = vsub.f32 2.0, %v1847_v11 }
 0x33b   : > { %v1975_v39 = vmul.f32 %v2600_v8, %v1911_v4 }
 0x33d   : > { %v2602_v49 = vpop.eup %2601  ;;  %v2039_v6 = vmul.f32 %v3727_v1, %v1975_v39 }
 0x33e   : > { %v2604_v21 = vpop.eup %2603  ;;  %v1879_v31 = vmul.f32 %v2602_v49, %v1751_v44 }
 0x33f   : > { %2103 = vst.msk [vmem:[%s3412_s26 + $0xf8] sm:$0xff] %vm1175_vm1, %v2039_v6  ;;  %v1877_v37 = vmul.f32 %v2604_v21, %v1745_v57 }
 0x340   : > { %v1943_v25 = vsub.f32 2.0, %v1879_v31 }
 0x341   : > { %v1941_v52 = vsub.f32 2.0, %v1877_v37 }
 0x342   : > { %v2007_v38 = vmul.f32 %v2602_v49, %v1943_v25 }
 0x343   : > { %v2005_v40 = vmul.f32 %v2604_v21, %v1941_v52 }
 0x344   : > { %v2071_v14 = vmul.f32 %v3739_v23, %v2007_v38 }
 0x345   : > { %v2069_v47 = vmul.f32 %v3737_v42, %v2005_v40 }
 0x346   : > { %2135 = vst.msk [vmem:[%s3412_s26 + $0x1f8] sm:$0xff] %vm1175_vm1, %v2071_v14 }
 0x347   : > { %2133 = vst.msk [vmem:[%s3412_s26 + $0x1e8] sm:$0xff] %vm1175_vm1, %v2069_v47 }
 0x348 PF: > { %s15_s18 = sadd.s32 1, %s2612_s18  }
 0x349   : > { %p12_p4 = scmp.ge.s32.totalorder %s15_s18, 4  }
 0x34b   :  { %14 = sbr.rel (!%p12_p4) target bundleno = 1 (0x1), region = 70 }

</bundles_post_ra>
